<compile_context>
chip_gen: v6e
topology: v6e:2x2x1
jax: 0.10.0
libtpu: 0.0.40
codegen_flags: <defaults>
</compile_context>

<pallas_src>
import functools

import jax
import jax.numpy as jnp
from jax import lax
from jax.experimental import pallas as pl
from jax.experimental.pallas import tpu as pltpu

EPS = 1e-5
NEG_SLOPE = 0.05

DEFAULT_MXU_DTYPE = jnp.bfloat16     # MXU operand dtype (f32 accumulation either way)
DEFAULT_INTER_DTYPE = jnp.bfloat16   # HBM dtype of the raw (pre-BN) stage intermediates

VMEM_LIMIT_BYTES = 32 * 1024 * 1024  # safe on v5e/v6e/v7x; can be raised on v5e/v6e
VMEM_BLOCK_BUDGET = 8 * 1024 * 1024  # per-grid-step working-set target (v7x: 64 MiB VMEM/TC)


def _round_up(v, m):
    return (v + m - 1) // m * m


# ---------------------------------------------------------------------------
# Kernels
# ---------------------------------------------------------------------------
def _make_conv_stage_kernel(B_BLK, c_in, c_out, H, W, pre_norm, mxu_dtype):
    """Per-batch-block kernel for one conv stage.

    Optionally applies the previous stage's BatchNorm+LeakyReLU (pre-folded per-channel
    scale/shift), zero-pads the flattened pixel axis, builds the im2col patch in a VMEM
    scratch and runs the 3x3 conv as a single (c_out, 9*Cin8) @ (9*Cin8, B_BLK*H*W) MXU
    matmul, writing the raw conv output plus per-block [sum, sum_sq] BN partials.
    """
    P = H * W
    PADW = W + 1                       # zero pad on each side of the flattened pixel axis
    CIN8 = _round_up(c_in, 8)          # 8-aligned channel slot per tap in the patch scratch

    def kernel(x_ref, w_ref, scale_ref, shift_ref, y_ref, stat_ref, patch_ref):
        # x_ref    : (B_BLK, c_in, P)      channel-sublane / pixel-lane activations
        # w_ref    : (c_out, 9*CIN8)       weights, taps folded into the contraction dim
        # scale/shift_ref : (c_in, 1)      prev-stage BN fold (ignored if not pre_norm)
        # y_ref    : (B_BLK, c_out, P)     raw (pre-BN) conv output
        # stat_ref : (1, c_out, 2)         per-grid-block [sum, sum_sq] over B_BLK*H*W pixels
        # patch_ref: (9*CIN8, B_BLK*P)     persistent VMEM im2col scratch
        x = x_ref[...].astype(jnp.float32)                      # (B, c_in, P)
        if pre_norm:
            # Previous stage's BatchNorm (batch stats) + LeakyReLU, fused here (f32 VPU math).
            x = x * scale_ref[...] + shift_ref[...]             # (c_in, 1) broadcasts
            x = jnp.where(x >= 0, x, NEG_SLOPE * x)
        xm = x.astype(mxu_dtype)                                # cast before the im2col copies

        # Column masks for the horizontal taps (computed once, lane-dense).
        col = lax.broadcasted_iota(jnp.int32, (1, 1, P), 2) % W
        not_first = col != 0                                    # dx = -1 valid (col > 0)
        not_last = col != (W - 1)                               # dx = +1 valid (col < W-1)

        # Zero-pad the flattened pixel axis by W+1 lanes per side: the vertical halo comes for
        # free, horizontal row-crossings are killed by the column masks.  All 256-lane dense.
        zpad = jnp.zeros((B_BLK, c_in, PADW), mxu_dtype)
        xp = jnp.concatenate([zpad, xm, zpad], axis=-1)         # (B, c_in, P + 2*(W+1))

        if c_in != CIN8:
            # Padded channel slots multiply zero weight columns; keep them zero (not garbage).
            patch_ref[...] = jnp.zeros((9 * CIN8, B_BLK * P), mxu_dtype)

        tap = 0
        for dy in (-1, 0, 1):
            for dx in (-1, 0, 1):
                d = dy * W + dx
                t = xp[:, :, PADW + d:PADW + d + P]             # static lane slice, (B, c_in, P)
                if dx == -1:
                    t = jnp.where(not_first, t, jnp.zeros_like(t))
                elif dx == 1:
                    t = jnp.where(not_last, t, jnp.zeros_like(t))
                for b in range(B_BLK):                          # 8-aligned sublane slots
                    patch_ref[tap * CIN8:tap * CIN8 + c_in, b * P:(b + 1) * P] = t[b]
                tap += 1

        # Single MXU matmul for the whole block; result is already channel-major.
        acc = jnp.dot(w_ref[...], patch_ref[...],
                      preferred_element_type=jnp.float32)       # (c_out, B_BLK*P) f32

        # BN batch-stat partials from the f32 accumulator (lane reduction -> XLU slot).
        # NOTE: var via E[x^2]-E[x]^2 in f32; fine at these (unit-scale) magnitudes.
        stat_ref[0, :, 0:1] = jnp.sum(acc, axis=-1, keepdims=True)
        stat_ref[0, :, 1:2] = jnp.sum(acc * acc, axis=-1, keepdims=True)

        y = acc.astype(y_ref.dtype)
        for b in range(B_BLK):                                  # aligned 256-lane slices
            y_ref[b] = y[:, b * P:(b + 1) * P]

    return kernel


def _finalize_kernel(y_ref, scale_ref, shift_ref, o_ref):
    """Final BatchNorm (pre-folded scale/shift) + LeakyReLU; all lane-dense."""
    y = y_ref[...].astype(jnp.float32)                          # (B, c_out, P)
    y = y * scale_ref[...] + shift_ref[...]                     # (c_out, 1) broadcasts
    o_ref[...] = jnp.where(y >= 0, y, NEG_SLOPE * y).astype(o_ref.dtype)


# ---------------------------------------------------------------------------
# pallas_call wrappers
# ---------------------------------------------------------------------------
def _pick_batch_block(N, c_in, c_out, P):
    """Images per grid step: keep grid >= 2 (v7x megacore) and blocks a few MiB (v7x 64MiB VMEM)."""
    cin8 = _round_up(c_in, 8)
    # Conservative (f32) per-image working set: double-buffered in/out + im2col scratch + temps.
    per_img = 4 * P * (2 * c_in + 2 * c_out + 9 * cin8 + 2 * c_in)
    cap = max(1, VMEM_BLOCK_BUDGET // per_img)
    best = 1
    for b in range(1, N + 1):
        if N % b == 0 and b <= cap and (N // b) >= 2:
            best = b
    return best


def _conv_stage(x, w_t, scale, shift, *, H, W, pre_norm, mxu_dtype, inter_dtype):
    """One 3x3 conv stage over a (N // B_BLK,) batch grid (parallel -> v7x megacore sharding)."""
    N, c_in, P = x.shape
    assert P == H * W
    c_out = w_t.shape[0]
    cin8 = _round_up(c_in, 8)
    assert w_t.shape == (c_out, 9 * cin8)
    assert scale.shape == (c_in, 1) and shift.shape == (c_in, 1)

    B_BLK = _pick_batch_block(N, c_in, c_out, P)
    G = N // B_BLK
    kernel = _make_conv_stage_kernel(B_BLK, c_in, c_out, H, W, pre_norm, mxu_dtype)

    grid_spec = pltpu.PrefetchScalarGridSpec(
        num_scalar_prefetch=0,
        grid=(G,),
        in_specs=[
            pl.BlockSpec((B_BLK, c_in, P), lambda n: (n, 0, 0)),
            pl.BlockSpec((c_out, 9 * cin8), lambda n: (0, 0)),   # weights resident across blocks
            pl.BlockSpec((c_in, 1), lambda n: (0, 0)),
            pl.BlockSpec((c_in, 1), lambda n: (0, 0)),
        ],
        out_specs=[
            pl.BlockSpec((B_BLK, c_out, P), lambda n: (n, 0, 0)),
            pl.BlockSpec((1, c_out, 2), lambda n: (n, 0, 0)),
        ],
        scratch_shapes=[pltpu.VMEM((9 * cin8, B_BLK * P), mxu_dtype)],
    )
    return pl.pallas_call(
        kernel,
        out_shape=(
            jax.ShapeDtypeStruct((N, c_out, P), inter_dtype),    # raw (pre-BN) conv output
            jax.ShapeDtypeStruct((G, c_out, 2), jnp.float32),    # per-block [sum, sum_sq]
        ),
        grid_spec=grid_spec,
        compiler_params=pltpu.CompilerParams(
            dimension_semantics=("parallel",),
            vmem_limit_bytes=VMEM_LIMIT_BYTES,
        ),
    )(x, w_t, scale, shift)


def _bn_finalize(y_raw, scale, shift):
    N, c_out, P = y_raw.shape
    B_BLK = _pick_batch_block(N, c_out, c_out, P)
    G = N // B_BLK
    grid_spec = pltpu.PrefetchScalarGridSpec(
        num_scalar_prefetch=0,
        grid=(G,),
        in_specs=[
            pl.BlockSpec((B_BLK, c_out, P), lambda n: (n, 0, 0)),
            pl.BlockSpec((c_out, 1), lambda n: (0, 0)),
            pl.BlockSpec((c_out, 1), lambda n: (0, 0)),
        ],
        out_specs=pl.BlockSpec((B_BLK, c_out, P), lambda n: (n, 0, 0)),
    )
    return pl.pallas_call(
        _finalize_kernel,
        out_shape=jax.ShapeDtypeStruct((N, c_out, P), jnp.float32),
        grid_spec=grid_spec,
        compiler_params=pltpu.CompilerParams(
            dimension_semantics=("parallel",),
            vmem_limit_bytes=VMEM_LIMIT_BYTES,
        ),
    )(y_raw, scale, shift)


# ---------------------------------------------------------------------------
# Host-side glue (tiny O(C) work only)
# ---------------------------------------------------------------------------
def _bn_scale_shift(stats, gamma, beta, count):
    """Fold train-mode BatchNorm (batch mean / biased var) + affine into per-channel scale/shift."""
    total = jnp.sum(stats, axis=0)                              # (c_out, 2) cross-block reduction
    mean = total[:, 0] / count
    var = jnp.maximum(total[:, 1] / count - mean * mean, 0.0)
    inv_std = lax.rsqrt(var + EPS)
    scale = gamma * inv_std
    shift = beta - mean * scale
    return scale.reshape(-1, 1), shift.reshape(-1, 1)


def _prep_weight(w_hwio, mxu_dtype):
    """(3,3,Cin,Cout) HWIO -> (Cout, 9*Cin8): taps folded into K, channel slots padded to 8."""
    kh, kw, cin, cout = w_hwio.shape
    cin8 = _round_up(cin, 8)
    w = w_hwio.reshape(kh * kw, cin, cout)
    w = jnp.pad(w, ((0, 0), (0, cin8 - cin), (0, 0)))
    w = w.reshape(kh * kw * cin8, cout)
    return jnp.transpose(w).astype(mxu_dtype)                   # cast hoisted out of the kernel


def conv_block_forward(x_nchw, params, *,
                       mxu_dtype=DEFAULT_MXU_DTYPE,
                       inter_dtype=DEFAULT_INTER_DTYPE):
    """Full ConvBlock forward. x_nchw: (N, Cin, H, W) -> (N, Cout, H, W)."""
    N, c_in, H, W = x_nchw.shape
    c_out = params["w1"].shape[-1]
    P = H * W
    count = N * P

    # NCHW is already channel-major: (N, C, H*W) is a free contiguous reshape (no transpose).
    x = x_nchw.reshape(N, c_in, P)

    w1 = _prep_weight(params["w1"], mxu_dtype)
    w2 = _prep_weight(params["w2"], mxu_dtype)
    one = jnp.ones((c_in, 1), jnp.float32)
    zero = jnp.zeros((c_in, 1), jnp.float32)

    # Stage 1: conv1 + per-block BN batch-stat partials.
    y1_raw, st1 = _conv_stage(x, w1, one, zero, H=H, W=W, pre_norm=False,
                              mxu_dtype=mxu_dtype, inter_dtype=inter_dtype)
    scale1, shift1 = _bn_scale_shift(st1, params["g1"], params["b1"], count)

    # Stage 2: BN1 + LeakyReLU + padding fused into the conv2 kernel (intermediate read once).
    y2_raw, st2 = _conv_stage(y1_raw, w2, scale1, shift1, H=H, W=W, pre_norm=True,
                              mxu_dtype=mxu_dtype, inter_dtype=inter_dtype)
    scale2, shift2 = _bn_scale_shift(st2, params["g2"], params["b2"], count)

    # Finalize: BN2 + LeakyReLU; output already (N, c_out, H*W) -> free reshape, no slice.
    y = _bn_finalize(y2_raw, scale2, shift2)
    return y.reshape(N, c_out, H, W)


# ---------------------------------------------------------------------------
# Reference, params, self-check
# ---------------------------------------------------------------------------
def _reference_forward(x_nchw, params):
    """Pure-JAX reference (conv 3x3 SAME / train-mode BN / LeakyReLU(0.05))."""
    def stage(x_nhwc, w, g, b):
        y = lax.conv_general_dilated(
            x_nhwc, w, window_strides=(1, 1), padding="SAME",
            dimension_numbers=("NHWC", "HWIO", "NHWC"),
            precision=lax.Precision.HIGHEST)
        mean = jnp.mean(y, axis=(0, 1, 2), keepdims=True)
        var = jnp.mean((y - mean) ** 2, axis=(0, 1, 2), keepdims=True)
        y = (y - mean) * lax.rsqrt(var + EPS) * g + b
        return jnp.where(y >= 0, y, NEG_SLOPE * y)

    x = jnp.transpose(x_nchw, (0, 2, 3, 1))
    y = stage(x, params["w1"], params["g1"], params["b1"])
    y = stage(y, params["w2"], params["g2"], params["b2"])
    return jnp.transpose(y, (0, 3, 1, 2))


def init_params(key, c_in, c_out):
    k1, k2 = jax.random.split(key)
    # Conv weights stored HWIO = (3, 3, Cin, Cout); bias=False as in the module.
    w1 = jax.random.normal(k1, (3, 3, c_in, c_out), jnp.float32) * 0.1
    w2 = jax.random.normal(k2, (3, 3, c_out, c_out), jnp.float32) * 0.1
    # BatchNorm2d default init: gamma = 1, beta = 0 (training mode -> batch statistics).
    # TODO(synk): running_mean/var buffer updates (training side effect) are not produced.
    return {
        "w1": w1, "g1": jnp.ones((c_out,), jnp.float32), "b1": jnp.zeros((c_out,), jnp.float32),
        "w2": w2, "g2": jnp.ones((c_out,), jnp.float32), "b2": jnp.zeros((c_out,), jnp.float32),
    }


if __name__ == "__main__":
    key = jax.random.PRNGKey(0)
    kx, kp = jax.random.split(key)

    N, C_IN, C_OUT, H, W = 2, 4, 8, 16, 16
    x = jax.random.normal(kx, (N, C_IN, H, W), jnp.float32)
    params = init_params(kp, C_IN, C_OUT)

    ref = jax.block_until_ready(_reference_forward(x, params))

    # Exact (f32 MXU / f32 intermediates) config: validates the kernel structure bit-tightly.
    fwd_exact = jax.jit(functools.partial(conv_block_forward,
                                          mxu_dtype=jnp.float32, inter_dtype=jnp.float32))
    out_exact = jax.block_until_ready(fwd_exact(x, params))
    assert out_exact.shape == (N, C_OUT, H, W), out_exact.shape
    err_exact = float(jnp.max(jnp.abs(out_exact - ref)))
    assert err_exact < 5e-4, err_exact

    # Performance config (default): bf16 MXU operands + bf16 stage intermediates.
    fwd_perf = jax.jit(conv_block_forward)
    out_perf = jax.block_until_ready(fwd_perf(x, params))
    assert out_perf.shape == (N, C_OUT, H, W), out_perf.shape
    err_perf = float(jnp.max(jnp.abs(out_perf - ref)))
    assert err_perf < 2.5e-1, err_perf

    print("KERNEL_OK")
</pallas_src>

<mosaic_0001>
module attributes {stable_mosaic.version = 11 : i64} {
  func.func @kernel(%arg0: i32, %arg1: memref<1x4x256xf32, #tpu.memory_space<vmem>>, %arg2: memref<8x72xf32, #tpu.memory_space<vmem>>, %arg3: memref<4x1xf32, #tpu.memory_space<vmem>>, %arg4: memref<4x1xf32, #tpu.memory_space<vmem>>, %arg5: memref<1x8x256xf32, #tpu.memory_space<vmem>>, %arg6: memref<1x8x2xf32, #tpu.memory_space<vmem>>, %arg7: memref<72x256xf32, #tpu.memory_space<vmem>>) attributes {dimension_semantics = [#tpu.dimension_semantics<parallel>], iteration_bounds = array<i64: 2>, scalar_prefetch = 0 : i64, scratch_operands = 1 : i64, tpu.core_type = #tpu.core_type<tc>, window_params = [{transform_indices = @transform_0, window_bounds = array<i64: 1, 4, 256>}, {pipeline_mode = #tpu.pipeline_mode<synchronous>, transform_indices = @transform_1, window_bounds = array<i64: 8, 72>}, {pipeline_mode = #tpu.pipeline_mode<synchronous>, transform_indices = @transform_2, window_bounds = array<i64: 4, 1>}, {pipeline_mode = #tpu.pipeline_mode<synchronous>, transform_indices = @transform_3, window_bounds = array<i64: 4, 1>}, {transform_indices = @transform_4, window_bounds = array<i64: 1, 8, 256>}, {transform_indices = @transform_5, window_bounds = array<i64: 1, 8, 2>}]} {
    %c0 = arith.constant 0 : index
    %c0_0 = arith.constant 0 : index
    %c0_1 = arith.constant 0 : index
    %0 = vector.load %arg1[%c0, %c0_0, %c0_1] : memref<1x4x256xf32, #tpu.memory_space<vmem>>, vector<1x4x256xf32>
    %1 = tpu.iota {dimensions = array<i32: 2>} : vector<1x1x256xi32>
    %c16_i32 = arith.constant 16 : i32
    %c0_i32 = arith.constant 0 : i32
    %2 = arith.cmpi eq, %c16_i32, %c0_i32 : i32
    %c1_i32 = arith.constant 1 : i32
    %3 = arith.select %2, %c1_i32, %c16_i32 : i32
    %4 = vector.broadcast %3 : i32 to vector<1x1x256xi32>
    %5 = arith.remsi %1, %4 : vector<1x1x256xi32>
    %c0_i32_2 = arith.constant 0 : i32
    %6 = vector.broadcast %c0_i32_2 : i32 to vector<1x1x256xi32>
    %7 = arith.cmpi ne, %5, %6 : vector<1x1x256xi32>
    %c0_i32_3 = arith.constant 0 : i32
    %8 = vector.broadcast %c0_i32_3 : i32 to vector<1x1x256xi32>
    %9 = arith.cmpi slt, %5, %8 : vector<1x1x256xi32>
    %c0_i32_4 = arith.constant 0 : i32
    %10 = arith.cmpi slt, %3, %c0_i32_4 : i32
    %11 = vector.broadcast %10 : i1 to vector<1x1x256xi1>
    %12 = vector.broadcast %11 : vector<1x1x256xi1> to vector<1x1x256xi1>
    %13 = arith.xori %9, %12 : vector<1x1x256xi1>
    %14 = arith.andi %13, %7 : vector<1x1x256xi1>
    %15 = vector.broadcast %3 : i32 to vector<1x1x256xi32>
    %16 = arith.addi %5, %15 : vector<1x1x256xi32>
    %17 = arith.select %14, %16, %5 : vector<1x1x256xi1>, vector<1x1x256xi32>
    %c0_i32_5 = arith.constant 0 : i32
    %18 = vector.broadcast %c0_i32_5 : i32 to vector<1x1x256xi32>
    %19 = arith.cmpi ne, %17, %18 : vector<1x1x256xi32>
    %c15_i32 = arith.constant 15 : i32
    %20 = vector.broadcast %c15_i32 : i32 to vector<1x1x256xi32>
    %21 = arith.cmpi ne, %17, %20 : vector<1x1x256xi32>
    %cst = arith.constant 0.000000e+00 : f32
    %22 = vector.broadcast %cst : f32 to vector<1x4x17xf32>
    %23 = tpu.concatenate %22, %0, %22 in 2 : vector<1x4x17xf32>, vector<1x4x256xf32>, vector<1x4x17xf32> -> vector<1x4x290xf32>
    %cst_6 = arith.constant 0.000000e+00 : f32
    %24 = vector.broadcast %cst_6 : f32 to vector<72x256xf32>
    %c0_7 = arith.constant 0 : index
    %c0_8 = arith.constant 0 : index
    %25 = vector.load %arg7[%c0_7, %c0_8] : memref<72x256xf32, #tpu.memory_space<vmem>>, vector<72x256xf32>
    tpu.vector_store %arg7[%c0_7, %c0_8], %24 {strides = array<i32>} : memref<72x256xf32, #tpu.memory_space<vmem>>, vector<72x256xf32>,
    %26 = vector.extract_strided_slice %23 {offsets = [0, 0, 0], sizes = [1, 4, 256], strides = [1, 1, 1]} : vector<1x4x290xf32> to vector<1x4x256xf32>
    %cst_9 = arith.constant 0.000000e+00 : f32
    %27 = vector.broadcast %cst_9 : f32 to vector<1x4x256xf32>
    %28 = vector.shape_cast %19 : vector<1x1x256xi1> to vector<1x1x256xi1>
    %29 = vector.broadcast %28 : vector<1x1x256xi1> to vector<1x4x256xi1>
    %30 = arith.select %29, %26, %27 : vector<1x4x256xi1>, vector<1x4x256xf32>
    %31 = vector.shape_cast %30 : vector<1x4x256xf32> to vector<4x256xf32>
    %c0_10 = arith.constant 0 : index
    %c0_11 = arith.constant 0 : index
    %32 = vector.load %arg7[%c0_10, %c0_11] : memref<72x256xf32, #tpu.memory_space<vmem>>, vector<4x256xf32>
    tpu.vector_store %arg7[%c0_10, %c0_11], %31 {strides = array<i32>} : memref<72x256xf32, #tpu.memory_space<vmem>>, vector<4x256xf32>,
    %33 = vector.extract_strided_slice %23 {offsets = [0, 0, 1], sizes = [1, 4, 256], strides = [1, 1, 1]} : vector<1x4x290xf32> to vector<1x4x256xf32>
    %34 = vector.shape_cast %33 : vector<1x4x256xf32> to vector<4x256xf32>
    %c8 = arith.constant 8 : index
    %c0_12 = arith.constant 0 : index
    %35 = vector.load %arg7[%c8, %c0_12] : memref<72x256xf32, #tpu.memory_space<vmem>>, vector<4x256xf32>
    tpu.vector_store %arg7[%c8, %c0_12], %34 {strides = array<i32>} : memref<72x256xf32, #tpu.memory_space<vmem>>, vector<4x256xf32>,
    %36 = vector.extract_strided_slice %23 {offsets = [0, 0, 2], sizes = [1, 4, 256], strides = [1, 1, 1]} : vector<1x4x290xf32> to vector<1x4x256xf32>
    %cst_13 = arith.constant 0.000000e+00 : f32
    %37 = vector.broadcast %cst_13 : f32 to vector<1x4x256xf32>
    %38 = vector.shape_cast %21 : vector<1x1x256xi1> to vector<1x1x256xi1>
    %39 = vector.broadcast %38 : vector<1x1x256xi1> to vector<1x4x256xi1>
    %40 = arith.select %39, %36, %37 : vector<1x4x256xi1>, vector<1x4x256xf32>
    %41 = vector.shape_cast %40 : vector<1x4x256xf32> to vector<4x256xf32>
    %c16 = arith.constant 16 : index
    %c0_14 = arith.constant 0 : index
    %42 = vector.load %arg7[%c16, %c0_14] : memref<72x256xf32, #tpu.memory_space<vmem>>, vector<4x256xf32>
    tpu.vector_store %arg7[%c16, %c0_14], %41 {strides = array<i32>} : memref<72x256xf32, #tpu.memory_space<vmem>>, vector<4x256xf32>,
    %43 = vector.extract_strided_slice %23 {offsets = [0, 0, 16], sizes = [1, 4, 256], strides = [1, 1, 1]} : vector<1x4x290xf32> to vector<1x4x256xf32>
    %cst_15 = arith.constant 0.000000e+00 : f32
    %44 = vector.broadcast %cst_15 : f32 to vector<1x4x256xf32>
    %45 = vector.shape_cast %19 : vector<1x1x256xi1> to vector<1x1x256xi1>
    %46 = vector.broadcast %45 : vector<1x1x256xi1> to vector<1x4x256xi1>
    %47 = arith.select %46, %43, %44 : vector<1x4x256xi1>, vector<1x4x256xf32>
    %48 = vector.shape_cast %47 : vector<1x4x256xf32> to vector<4x256xf32>
    %c24 = arith.constant 24 : index
    %c0_16 = arith.constant 0 : index
    %49 = vector.load %arg7[%c24, %c0_16] : memref<72x256xf32, #tpu.memory_space<vmem>>, vector<4x256xf32>
    tpu.vector_store %arg7[%c24, %c0_16], %48 {strides = array<i32>} : memref<72x256xf32, #tpu.memory_space<vmem>>, vector<4x256xf32>,
    %50 = vector.extract_strided_slice %23 {offsets = [0, 0, 17], sizes = [1, 4, 256], strides = [1, 1, 1]} : vector<1x4x290xf32> to vector<1x4x256xf32>
    %51 = vector.shape_cast %50 : vector<1x4x256xf32> to vector<4x256xf32>
    %c32 = arith.constant 32 : index
    %c0_17 = arith.constant 0 : index
    %52 = vector.load %arg7[%c32, %c0_17] : memref<72x256xf32, #tpu.memory_space<vmem>>, vector<4x256xf32>
    tpu.vector_store %arg7[%c32, %c0_17], %51 {strides = array<i32>} : memref<72x256xf32, #tpu.memory_space<vmem>>, vector<4x256xf32>,
    %53 = vector.extract_strided_slice %23 {offsets = [0, 0, 18], sizes = [1, 4, 256], strides = [1, 1, 1]} : vector<1x4x290xf32> to vector<1x4x256xf32>
    %cst_18 = arith.constant 0.000000e+00 : f32
    %54 = vector.broadcast %cst_18 : f32 to vector<1x4x256xf32>
    %55 = vector.shape_cast %21 : vector<1x1x256xi1> to vector<1x1x256xi1>
    %56 = vector.broadcast %55 : vector<1x1x256xi1> to vector<1x4x256xi1>
    %57 = arith.select %56, %53, %54 : vector<1x4x256xi1>, vector<1x4x256xf32>
    %58 = vector.shape_cast %57 : vector<1x4x256xf32> to vector<4x256xf32>
    %c40 = arith.constant 40 : index
    %c0_19 = arith.constant 0 : index
    %59 = vector.load %arg7[%c40, %c0_19] : memref<72x256xf32, #tpu.memory_space<vmem>>, vector<4x256xf32>
    tpu.vector_store %arg7[%c40, %c0_19], %58 {strides = array<i32>} : memref<72x256xf32, #tpu.memory_space<vmem>>, vector<4x256xf32>,
    %60 = vector.extract_strided_slice %23 {offsets = [0, 0, 32], sizes = [1, 4, 256], strides = [1, 1, 1]} : vector<1x4x290xf32> to vector<1x4x256xf32>
    %cst_20 = arith.constant 0.000000e+00 : f32
    %61 = vector.broadcast %cst_20 : f32 to vector<1x4x256xf32>
    %62 = vector.shape_cast %19 : vector<1x1x256xi1> to vector<1x1x256xi1>
    %63 = vector.broadcast %62 : vector<1x1x256xi1> to vector<1x4x256xi1>
    %64 = arith.select %63, %60, %61 : vector<1x4x256xi1>, vector<1x4x256xf32>
    %65 = vector.shape_cast %64 : vector<1x4x256xf32> to vector<4x256xf32>
    %c48 = arith.constant 48 : index
    %c0_21 = arith.constant 0 : index
    %66 = vector.load %arg7[%c48, %c0_21] : memref<72x256xf32, #tpu.memory_space<vmem>>, vector<4x256xf32>
    tpu.vector_store %arg7[%c48, %c0_21], %65 {strides = array<i32>} : memref<72x256xf32, #tpu.memory_space<vmem>>, vector<4x256xf32>,
    %67 = vector.extract_strided_slice %23 {offsets = [0, 0, 33], sizes = [1, 4, 256], strides = [1, 1, 1]} : vector<1x4x290xf32> to vector<1x4x256xf32>
    %68 = vector.shape_cast %67 : vector<1x4x256xf32> to vector<4x256xf32>
    %c56 = arith.constant 56 : index
    %c0_22 = arith.constant 0 : index
    %69 = vector.load %arg7[%c56, %c0_22] : memref<72x256xf32, #tpu.memory_space<vmem>>, vector<4x256xf32>
    tpu.vector_store %arg7[%c56, %c0_22], %68 {strides = array<i32>} : memref<72x256xf32, #tpu.memory_space<vmem>>, vector<4x256xf32>,
    %70 = vector.extract_strided_slice %23 {offsets = [0, 0, 34], sizes = [1, 4, 256], strides = [1, 1, 1]} : vector<1x4x290xf32> to vector<1x4x256xf32>
    %cst_23 = arith.constant 0.000000e+00 : f32
    %71 = vector.broadcast %cst_23 : f32 to vector<1x4x256xf32>
    %72 = vector.shape_cast %21 : vector<1x1x256xi1> to vector<1x1x256xi1>
    %73 = vector.broadcast %72 : vector<1x1x256xi1> to vector<1x4x256xi1>
    %74 = arith.select %73, %70, %71 : vector<1x4x256xi1>, vector<1x4x256xf32>
    %75 = vector.shape_cast %74 : vector<1x4x256xf32> to vector<4x256xf32>
    %c64 = arith.constant 64 : index
    %c0_24 = arith.constant 0 : index
    %76 = vector.load %arg7[%c64, %c0_24] : memref<72x256xf32, #tpu.memory_space<vmem>>, vector<4x256xf32>
    tpu.vector_store %arg7[%c64, %c0_24], %75 {strides = array<i32>} : memref<72x256xf32, #tpu.memory_space<vmem>>, vector<4x256xf32>,
    %c0_25 = arith.constant 0 : index
    %c0_26 = arith.constant 0 : index
    %77 = vector.load %arg2[%c0_25, %c0_26] : memref<8x72xf32, #tpu.memory_space<vmem>>, vector<8x72xf32>
    %c0_27 = arith.constant 0 : index
    %c0_28 = arith.constant 0 : index
    %78 = vector.load %arg7[%c0_27, %c0_28] : memref<72x256xf32, #tpu.memory_space<vmem>>, vector<72x256xf32>
    %cst_29 = arith.constant dense<0.000000e+00> : vector<8x256xf32>
    %79 = tpu.matmul %77, %78, %cst_29 {dimension_numbers = #tpu.dot_dimension_numbers<[1], [0], [0], [1], [0, 0, 1, 1], [], []>} : vector<8x72xf32>, vector<72x256xf32>, vector<8x256xf32> -> vector<8x256xf32>
    %cst_30 = arith.constant dense<0.000000e+00> : vector<8xf32>
    %80 = vector.multi_reduction <add>, %79, %cst_30 [1] : vector<8x256xf32> to vector<8xf32>
    %81 = vector.shape_cast %80 : vector<8xf32> to vector<8x1xf32>
    %c0_31 = arith.constant 0 : index
    %c0_32 = arith.constant 0 : index
    %c0_33 = arith.constant 0 : index
    %82 = vector.load %arg6[%c0_31, %c0_32, %c0_33] : memref<1x8x2xf32, #tpu.memory_space<vmem>>, vector<1x8x1xf32>
    %83 = vector.shape_cast %82 : vector<1x8x1xf32> to vector<8x1xf32>
    %84 = vector.shape_cast %81 : vector<8x1xf32> to vector<1x8x1xf32>
    tpu.vector_store %arg6[%c0_31, %c0_32, %c0_33], %84 {strides = array<i32>} : memref<1x8x2xf32, #tpu.memory_space<vmem>>, vector<1x8x1xf32>,
    %85 = arith.mulf %79, %79 : vector<8x256xf32>
    %cst_34 = arith.constant dense<0.000000e+00> : vector<8xf32>
    %86 = vector.multi_reduction <add>, %85, %cst_34 [1] : vector<8x256xf32> to vector<8xf32>
    %87 = vector.shape_cast %86 : vector<8xf32> to vector<8x1xf32>
    %c0_35 = arith.constant 0 : index
    %c0_36 = arith.constant 0 : index
    %c1 = arith.constant 1 : index
    %88 = vector.load %arg6[%c0_35, %c0_36, %c1] : memref<1x8x2xf32, #tpu.memory_space<vmem>>, vector<1x8x1xf32>
    %89 = vector.shape_cast %88 : vector<1x8x1xf32> to vector<8x1xf32>
    %90 = vector.shape_cast %87 : vector<8x1xf32> to vector<1x8x1xf32>
    tpu.vector_store %arg6[%c0_35, %c0_36, %c1], %90 {strides = array<i32>} : memref<1x8x2xf32, #tpu.memory_space<vmem>>, vector<1x8x1xf32>,
    %c0_37 = arith.constant 0 : index
    %c0_38 = arith.constant 0 : index
    %c0_39 = arith.constant 0 : index
    %91 = vector.load %arg5[%c0_37, %c0_38, %c0_39] : memref<1x8x256xf32, #tpu.memory_space<vmem>>, vector<1x8x256xf32>
    %92 = vector.shape_cast %91 : vector<1x8x256xf32> to vector<8x256xf32>
    %93 = vector.shape_cast %79 : vector<8x256xf32> to vector<1x8x256xf32>
    tpu.vector_store %arg5[%c0_37, %c0_38, %c0_39], %93 {strides = array<i32>} : memref<1x8x256xf32, #tpu.memory_space<vmem>>, vector<1x8x256xf32>,
    return
  }
  func.func @transform_0(%arg0: i32) -> (i32, i32, i32) {
    %c0_i32 = arith.constant 0 : i32
    %c0_i32_0 = arith.constant 0 : i32
    %c0_i32_1 = arith.constant 0 : i32
    return %arg0, %c0_i32, %c0_i32_0 : i32, i32, i32
  }
  func.func @transform_1(%arg0: i32) -> (i32, i32) {
    %c0_i32 = arith.constant 0 : i32
    %c0_i32_0 = arith.constant 0 : i32
    %c0_i32_1 = arith.constant 0 : i32
    return %c0_i32, %c0_i32_0 : i32, i32
  }
  func.func @transform_2(%arg0: i32) -> (i32, i32) {
    %c0_i32 = arith.constant 0 : i32
    %c0_i32_0 = arith.constant 0 : i32
    %c0_i32_1 = arith.constant 0 : i32
    return %c0_i32, %c0_i32_0 : i32, i32
  }
  func.func @transform_3(%arg0: i32) -> (i32, i32) {
    %c0_i32 = arith.constant 0 : i32
    %c0_i32_0 = arith.constant 0 : i32
    %c0_i32_1 = arith.constant 0 : i32
    return %c0_i32, %c0_i32_0 : i32, i32
  }
  func.func @transform_4(%arg0: i32) -> (i32, i32, i32) {
    %c0_i32 = arith.constant 0 : i32
    %c0_i32_0 = arith.constant 0 : i32
    %c0_i32_1 = arith.constant 0 : i32
    return %arg0, %c0_i32, %c0_i32_0 : i32, i32, i32
  }
  func.func @transform_5(%arg0: i32) -> (i32, i32, i32) {
    %c0_i32 = arith.constant 0 : i32
    %c0_i32_0 = arith.constant 0 : i32
    %c0_i32_1 = arith.constant 0 : i32
    return %arg0, %c0_i32, %c0_i32_0 : i32, i32, i32
  }
}

module attributes {stable_mosaic.version = 11 : i64} {
  func.func @kernel(%arg0: i32, %arg1: memref<1x8x256xf32, #tpu.memory_space<vmem>>, %arg2: memref<8x72xf32, #tpu.memory_space<vmem>>, %arg3: memref<8x1xf32, #tpu.memory_space<vmem>>, %arg4: memref<8x1xf32, #tpu.memory_space<vmem>>, %arg5: memref<1x8x256xf32, #tpu.memory_space<vmem>>, %arg6: memref<1x8x2xf32, #tpu.memory_space<vmem>>, %arg7: memref<72x256xf32, #tpu.memory_space<vmem>>) attributes {dimension_semantics = [#tpu.dimension_semantics<parallel>], iteration_bounds = array<i64: 2>, scalar_prefetch = 0 : i64, scratch_operands = 1 : i64, tpu.core_type = #tpu.core_type<tc>, window_params = [{transform_indices = @transform_0, window_bounds = array<i64: 1, 8, 256>}, {pipeline_mode = #tpu.pipeline_mode<synchronous>, transform_indices = @transform_1, window_bounds = array<i64: 8, 72>}, {pipeline_mode = #tpu.pipeline_mode<synchronous>, transform_indices = @transform_2, window_bounds = array<i64: 8, 1>}, {pipeline_mode = #tpu.pipeline_mode<synchronous>, transform_indices = @transform_3, window_bounds = array<i64: 8, 1>}, {transform_indices = @transform_4, window_bounds = array<i64: 1, 8, 256>}, {transform_indices = @transform_5, window_bounds = array<i64: 1, 8, 2>}]} {
    %c0 = arith.constant 0 : index
    %c0_0 = arith.constant 0 : index
    %c0_1 = arith.constant 0 : index
    %0 = vector.load %arg1[%c0, %c0_0, %c0_1] : memref<1x8x256xf32, #tpu.memory_space<vmem>>, vector<1x8x256xf32>
    %c0_2 = arith.constant 0 : index
    %c0_3 = arith.constant 0 : index
    %1 = vector.load %arg3[%c0_2, %c0_3] : memref<8x1xf32, #tpu.memory_space<vmem>>, vector<8x1xf32>
    %2 = vector.shape_cast %1 : vector<8x1xf32> to vector<1x8x1xf32>
    %3 = vector.broadcast %2 : vector<1x8x1xf32> to vector<1x8x256xf32>
    %4 = arith.mulf %0, %3 : vector<1x8x256xf32>
    %c0_4 = arith.constant 0 : index
    %c0_5 = arith.constant 0 : index
    %5 = vector.load %arg4[%c0_4, %c0_5] : memref<8x1xf32, #tpu.memory_space<vmem>>, vector<8x1xf32>
    %6 = vector.shape_cast %5 : vector<8x1xf32> to vector<1x8x1xf32>
    %7 = vector.broadcast %6 : vector<1x8x1xf32> to vector<1x8x256xf32>
    %8 = arith.addf %4, %7 : vector<1x8x256xf32>
    %cst = arith.constant 0.000000e+00 : f32
    %9 = vector.broadcast %cst : f32 to vector<1x8x256xf32>
    %10 = arith.cmpf oge, %8, %9 : vector<1x8x256xf32>
    %cst_6 = arith.constant 5.000000e-02 : f32
    %11 = vector.broadcast %cst_6 : f32 to vector<1x8x256xf32>
    %12 = arith.mulf %11, %8 : vector<1x8x256xf32>
    %13 = arith.select %10, %8, %12 : vector<1x8x256xi1>, vector<1x8x256xf32>
    %14 = tpu.iota {dimensions = array<i32: 2>} : vector<1x1x256xi32>
    %c16_i32 = arith.constant 16 : i32
    %c0_i32 = arith.constant 0 : i32
    %15 = arith.cmpi eq, %c16_i32, %c0_i32 : i32
    %c1_i32 = arith.constant 1 : i32
    %16 = arith.select %15, %c1_i32, %c16_i32 : i32
    %17 = vector.broadcast %16 : i32 to vector<1x1x256xi32>
    %18 = arith.remsi %14, %17 : vector<1x1x256xi32>
    %c0_i32_7 = arith.constant 0 : i32
    %19 = vector.broadcast %c0_i32_7 : i32 to vector<1x1x256xi32>
    %20 = arith.cmpi ne, %18, %19 : vector<1x1x256xi32>
    %c0_i32_8 = arith.constant 0 : i32
    %21 = vector.broadcast %c0_i32_8 : i32 to vector<1x1x256xi32>
    %22 = arith.cmpi slt, %18, %21 : vector<1x1x256xi32>
    %c0_i32_9 = arith.constant 0 : i32
    %23 = arith.cmpi slt, %16, %c0_i32_9 : i32
    %24 = vector.broadcast %23 : i1 to vector<1x1x256xi1>
    %25 = vector.broadcast %24 : vector<1x1x256xi1> to vector<1x1x256xi1>
    %26 = arith.xori %22, %25 : vector<1x1x256xi1>
    %27 = arith.andi %26, %20 : vector<1x1x256xi1>
    %28 = vector.broadcast %16 : i32 to vector<1x1x256xi32>
    %29 = arith.addi %18, %28 : vector<1x1x256xi32>
    %30 = arith.select %27, %29, %18 : vector<1x1x256xi1>, vector<1x1x256xi32>
    %c0_i32_10 = arith.constant 0 : i32
    %31 = vector.broadcast %c0_i32_10 : i32 to vector<1x1x256xi32>
    %32 = arith.cmpi ne, %30, %31 : vector<1x1x256xi32>
    %c15_i32 = arith.constant 15 : i32
    %33 = vector.broadcast %c15_i32 : i32 to vector<1x1x256xi32>
    %34 = arith.cmpi ne, %30, %33 : vector<1x1x256xi32>
    %cst_11 = arith.constant 0.000000e+00 : f32
    %35 = vector.broadcast %cst_11 : f32 to vector<1x8x17xf32>
    %36 = tpu.concatenate %35, %13, %35 in 2 : vector<1x8x17xf32>, vector<1x8x256xf32>, vector<1x8x17xf32> -> vector<1x8x290xf32>
    %37 = vector.extract_strided_slice %36 {offsets = [0, 0, 0], sizes = [1, 8, 256], strides = [1, 1, 1]} : vector<1x8x290xf32> to vector<1x8x256xf32>
    %cst_12 = arith.constant 0.000000e+00 : f32
    %38 = vector.broadcast %cst_12 : f32 to vector<1x8x256xf32>
    %39 = vector.shape_cast %32 : vector<1x1x256xi1> to vector<1x1x256xi1>
    %40 = vector.broadcast %39 : vector<1x1x256xi1> to vector<1x8x256xi1>
    %41 = arith.select %40, %37, %38 : vector<1x8x256xi1>, vector<1x8x256xf32>
    %42 = vector.shape_cast %41 : vector<1x8x256xf32> to vector<8x256xf32>
    %c0_13 = arith.constant 0 : index
    %c0_14 = arith.constant 0 : index
    %43 = vector.load %arg7[%c0_13, %c0_14] : memref<72x256xf32, #tpu.memory_space<vmem>>, vector<8x256xf32>
    tpu.vector_store %arg7[%c0_13, %c0_14], %42 {strides = array<i32>} : memref<72x256xf32, #tpu.memory_space<vmem>>, vector<8x256xf32>,
    %44 = vector.extract_strided_slice %36 {offsets = [0, 0, 1], sizes = [1, 8, 256], strides = [1, 1, 1]} : vector<1x8x290xf32> to vector<1x8x256xf32>
    %45 = vector.shape_cast %44 : vector<1x8x256xf32> to vector<8x256xf32>
    %c8 = arith.constant 8 : index
    %c0_15 = arith.constant 0 : index
    %46 = vector.load %arg7[%c8, %c0_15] : memref<72x256xf32, #tpu.memory_space<vmem>>, vector<8x256xf32>
    tpu.vector_store %arg7[%c8, %c0_15], %45 {strides = array<i32>} : memref<72x256xf32, #tpu.memory_space<vmem>>, vector<8x256xf32>,
    %47 = vector.extract_strided_slice %36 {offsets = [0, 0, 2], sizes = [1, 8, 256], strides = [1, 1, 1]} : vector<1x8x290xf32> to vector<1x8x256xf32>
    %cst_16 = arith.constant 0.000000e+00 : f32
    %48 = vector.broadcast %cst_16 : f32 to vector<1x8x256xf32>
    %49 = vector.shape_cast %34 : vector<1x1x256xi1> to vector<1x1x256xi1>
    %50 = vector.broadcast %49 : vector<1x1x256xi1> to vector<1x8x256xi1>
    %51 = arith.select %50, %47, %48 : vector<1x8x256xi1>, vector<1x8x256xf32>
    %52 = vector.shape_cast %51 : vector<1x8x256xf32> to vector<8x256xf32>
    %c16 = arith.constant 16 : index
    %c0_17 = arith.constant 0 : index
    %53 = vector.load %arg7[%c16, %c0_17] : memref<72x256xf32, #tpu.memory_space<vmem>>, vector<8x256xf32>
    tpu.vector_store %arg7[%c16, %c0_17], %52 {strides = array<i32>} : memref<72x256xf32, #tpu.memory_space<vmem>>, vector<8x256xf32>,
    %54 = vector.extract_strided_slice %36 {offsets = [0, 0, 16], sizes = [1, 8, 256], strides = [1, 1, 1]} : vector<1x8x290xf32> to vector<1x8x256xf32>
    %cst_18 = arith.constant 0.000000e+00 : f32
    %55 = vector.broadcast %cst_18 : f32 to vector<1x8x256xf32>
    %56 = vector.shape_cast %32 : vector<1x1x256xi1> to vector<1x1x256xi1>
    %57 = vector.broadcast %56 : vector<1x1x256xi1> to vector<1x8x256xi1>
    %58 = arith.select %57, %54, %55 : vector<1x8x256xi1>, vector<1x8x256xf32>
    %59 = vector.shape_cast %58 : vector<1x8x256xf32> to vector<8x256xf32>
    %c24 = arith.constant 24 : index
    %c0_19 = arith.constant 0 : index
    %60 = vector.load %arg7[%c24, %c0_19] : memref<72x256xf32, #tpu.memory_space<vmem>>, vector<8x256xf32>
    tpu.vector_store %arg7[%c24, %c0_19], %59 {strides = array<i32>} : memref<72x256xf32, #tpu.memory_space<vmem>>, vector<8x256xf32>,
    %61 = vector.extract_strided_slice %36 {offsets = [0, 0, 17], sizes = [1, 8, 256], strides = [1, 1, 1]} : vector<1x8x290xf32> to vector<1x8x256xf32>
    %62 = vector.shape_cast %61 : vector<1x8x256xf32> to vector<8x256xf32>
    %c32 = arith.constant 32 : index
    %c0_20 = arith.constant 0 : index
    %63 = vector.load %arg7[%c32, %c0_20] : memref<72x256xf32, #tpu.memory_space<vmem>>, vector<8x256xf32>
    tpu.vector_store %arg7[%c32, %c0_20], %62 {strides = array<i32>} : memref<72x256xf32, #tpu.memory_space<vmem>>, vector<8x256xf32>,
    %64 = vector.extract_strided_slice %36 {offsets = [0, 0, 18], sizes = [1, 8, 256], strides = [1, 1, 1]} : vector<1x8x290xf32> to vector<1x8x256xf32>
    %cst_21 = arith.constant 0.000000e+00 : f32
    %65 = vector.broadcast %cst_21 : f32 to vector<1x8x256xf32>
    %66 = vector.shape_cast %34 : vector<1x1x256xi1> to vector<1x1x256xi1>
    %67 = vector.broadcast %66 : vector<1x1x256xi1> to vector<1x8x256xi1>
    %68 = arith.select %67, %64, %65 : vector<1x8x256xi1>, vector<1x8x256xf32>
    %69 = vector.shape_cast %68 : vector<1x8x256xf32> to vector<8x256xf32>
    %c40 = arith.constant 40 : index
    %c0_22 = arith.constant 0 : index
    %70 = vector.load %arg7[%c40, %c0_22] : memref<72x256xf32, #tpu.memory_space<vmem>>, vector<8x256xf32>
    tpu.vector_store %arg7[%c40, %c0_22], %69 {strides = array<i32>} : memref<72x256xf32, #tpu.memory_space<vmem>>, vector<8x256xf32>,
    %71 = vector.extract_strided_slice %36 {offsets = [0, 0, 32], sizes = [1, 8, 256], strides = [1, 1, 1]} : vector<1x8x290xf32> to vector<1x8x256xf32>
    %cst_23 = arith.constant 0.000000e+00 : f32
    %72 = vector.broadcast %cst_23 : f32 to vector<1x8x256xf32>
    %73 = vector.shape_cast %32 : vector<1x1x256xi1> to vector<1x1x256xi1>
    %74 = vector.broadcast %73 : vector<1x1x256xi1> to vector<1x8x256xi1>
    %75 = arith.select %74, %71, %72 : vector<1x8x256xi1>, vector<1x8x256xf32>
    %76 = vector.shape_cast %75 : vector<1x8x256xf32> to vector<8x256xf32>
    %c48 = arith.constant 48 : index
    %c0_24 = arith.constant 0 : index
    %77 = vector.load %arg7[%c48, %c0_24] : memref<72x256xf32, #tpu.memory_space<vmem>>, vector<8x256xf32>
    tpu.vector_store %arg7[%c48, %c0_24], %76 {strides = array<i32>} : memref<72x256xf32, #tpu.memory_space<vmem>>, vector<8x256xf32>,
    %78 = vector.extract_strided_slice %36 {offsets = [0, 0, 33], sizes = [1, 8, 256], strides = [1, 1, 1]} : vector<1x8x290xf32> to vector<1x8x256xf32>
    %79 = vector.shape_cast %78 : vector<1x8x256xf32> to vector<8x256xf32>
    %c56 = arith.constant 56 : index
    %c0_25 = arith.constant 0 : index
    %80 = vector.load %arg7[%c56, %c0_25] : memref<72x256xf32, #tpu.memory_space<vmem>>, vector<8x256xf32>
    tpu.vector_store %arg7[%c56, %c0_25], %79 {strides = array<i32>} : memref<72x256xf32, #tpu.memory_space<vmem>>, vector<8x256xf32>,
    %81 = vector.extract_strided_slice %36 {offsets = [0, 0, 34], sizes = [1, 8, 256], strides = [1, 1, 1]} : vector<1x8x290xf32> to vector<1x8x256xf32>
    %cst_26 = arith.constant 0.000000e+00 : f32
    %82 = vector.broadcast %cst_26 : f32 to vector<1x8x256xf32>
    %83 = vector.shape_cast %34 : vector<1x1x256xi1> to vector<1x1x256xi1>
    %84 = vector.broadcast %83 : vector<1x1x256xi1> to vector<1x8x256xi1>
    %85 = arith.select %84, %81, %82 : vector<1x8x256xi1>, vector<1x8x256xf32>
    %86 = vector.shape_cast %85 : vector<1x8x256xf32> to vector<8x256xf32>
    %c64 = arith.constant 64 : index
    %c0_27 = arith.constant 0 : index
    %87 = vector.load %arg7[%c64, %c0_27] : memref<72x256xf32, #tpu.memory_space<vmem>>, vector<8x256xf32>
    tpu.vector_store %arg7[%c64, %c0_27], %86 {strides = array<i32>} : memref<72x256xf32, #tpu.memory_space<vmem>>, vector<8x256xf32>,
    %c0_28 = arith.constant 0 : index
    %c0_29 = arith.constant 0 : index
    %88 = vector.load %arg2[%c0_28, %c0_29] : memref<8x72xf32, #tpu.memory_space<vmem>>, vector<8x72xf32>
    %c0_30 = arith.constant 0 : index
    %c0_31 = arith.constant 0 : index
    %89 = vector.load %arg7[%c0_30, %c0_31] : memref<72x256xf32, #tpu.memory_space<vmem>>, vector<72x256xf32>
    %cst_32 = arith.constant dense<0.000000e+00> : vector<8x256xf32>
    %90 = tpu.matmul %88, %89, %cst_32 {dimension_numbers = #tpu.dot_dimension_numbers<[1], [0], [0], [1], [0, 0, 1, 1], [], []>} : vector<8x72xf32>, vector<72x256xf32>, vector<8x256xf32> -> vector<8x256xf32>
    %cst_33 = arith.constant dense<0.000000e+00> : vector<8xf32>
    %91 = vector.multi_reduction <add>, %90, %cst_33 [1] : vector<8x256xf32> to vector<8xf32>
    %92 = vector.shape_cast %91 : vector<8xf32> to vector<8x1xf32>
    %c0_34 = arith.constant 0 : index
    %c0_35 = arith.constant 0 : index
    %c0_36 = arith.constant 0 : index
    %93 = vector.load %arg6[%c0_34, %c0_35, %c0_36] : memref<1x8x2xf32, #tpu.memory_space<vmem>>, vector<1x8x1xf32>
    %94 = vector.shape_cast %93 : vector<1x8x1xf32> to vector<8x1xf32>
    %95 = vector.shape_cast %92 : vector<8x1xf32> to vector<1x8x1xf32>
    tpu.vector_store %arg6[%c0_34, %c0_35, %c0_36], %95 {strides = array<i32>} : memref<1x8x2xf32, #tpu.memory_space<vmem>>, vector<1x8x1xf32>,
    %96 = arith.mulf %90, %90 : vector<8x256xf32>
    %cst_37 = arith.constant dense<0.000000e+00> : vector<8xf32>
    %97 = vector.multi_reduction <add>, %96, %cst_37 [1] : vector<8x256xf32> to vector<8xf32>
    %98 = vector.shape_cast %97 : vector<8xf32> to vector<8x1xf32>
    %c0_38 = arith.constant 0 : index
    %c0_39 = arith.constant 0 : index
    %c1 = arith.constant 1 : index
    %99 = vector.load %arg6[%c0_38, %c0_39, %c1] : memref<1x8x2xf32, #tpu.memory_space<vmem>>, vector<1x8x1xf32>
    %100 = vector.shape_cast %99 : vector<1x8x1xf32> to vector<8x1xf32>
    %101 = vector.shape_cast %98 : vector<8x1xf32> to vector<1x8x1xf32>
    tpu.vector_store %arg6[%c0_38, %c0_39, %c1], %101 {strides = array<i32>} : memref<1x8x2xf32, #tpu.memory_space<vmem>>, vector<1x8x1xf32>,
    %c0_40 = arith.constant 0 : index
    %c0_41 = arith.constant 0 : index
    %c0_42 = arith.constant 0 : index
    %102 = vector.load %arg5[%c0_40, %c0_41, %c0_42] : memref<1x8x256xf32, #tpu.memory_space<vmem>>, vector<1x8x256xf32>
    %103 = vector.shape_cast %102 : vector<1x8x256xf32> to vector<8x256xf32>
    %104 = vector.shape_cast %90 : vector<8x256xf32> to vector<1x8x256xf32>
    tpu.vector_store %arg5[%c0_40, %c0_41, %c0_42], %104 {strides = array<i32>} : memref<1x8x256xf32, #tpu.memory_space<vmem>>, vector<1x8x256xf32>,
    return
  }
  func.func @transform_0(%arg0: i32) -> (i32, i32, i32) {
    %c0_i32 = arith.constant 0 : i32
    %c0_i32_0 = arith.constant 0 : i32
    %c0_i32_1 = arith.constant 0 : i32
    return %arg0, %c0_i32, %c0_i32_0 : i32, i32, i32
  }
  func.func @transform_1(%arg0: i32) -> (i32, i32) {
    %c0_i32 = arith.constant 0 : i32
    %c0_i32_0 = arith.constant 0 : i32
    %c0_i32_1 = arith.constant 0 : i32
    return %c0_i32, %c0_i32_0 : i32, i32
  }
  func.func @transform_2(%arg0: i32) -> (i32, i32) {
    %c0_i32 = arith.constant 0 : i32
    %c0_i32_0 = arith.constant 0 : i32
    %c0_i32_1 = arith.constant 0 : i32
    return %c0_i32, %c0_i32_0 : i32, i32
  }
  func.func @transform_3(%arg0: i32) -> (i32, i32) {
    %c0_i32 = arith.constant 0 : i32
    %c0_i32_0 = arith.constant 0 : i32
    %c0_i32_1 = arith.constant 0 : i32
    return %c0_i32, %c0_i32_0 : i32, i32
  }
  func.func @transform_4(%arg0: i32) -> (i32, i32, i32) {
    %c0_i32 = arith.constant 0 : i32
    %c0_i32_0 = arith.constant 0 : i32
    %c0_i32_1 = arith.constant 0 : i32
    return %arg0, %c0_i32, %c0_i32_0 : i32, i32, i32
  }
  func.func @transform_5(%arg0: i32) -> (i32, i32, i32) {
    %c0_i32 = arith.constant 0 : i32
    %c0_i32_0 = arith.constant 0 : i32
    %c0_i32_1 = arith.constant 0 : i32
    return %arg0, %c0_i32, %c0_i32_0 : i32, i32, i32
  }
}

module attributes {stable_mosaic.version = 11 : i64} {
  func.func @_finalize_kernel(%arg0: i32, %arg1: memref<1x8x256xf32, #tpu.memory_space<vmem>>, %arg2: memref<8x1xf32, #tpu.memory_space<vmem>>, %arg3: memref<8x1xf32, #tpu.memory_space<vmem>>, %arg4: memref<1x8x256xf32, #tpu.memory_space<vmem>>) attributes {dimension_semantics = [#tpu.dimension_semantics<parallel>], iteration_bounds = array<i64: 2>, scalar_prefetch = 0 : i64, scratch_operands = 0 : i64, tpu.core_type = #tpu.core_type<tc>, window_params = [{transform_indices = @transform_0, window_bounds = array<i64: 1, 8, 256>}, {pipeline_mode = #tpu.pipeline_mode<synchronous>, transform_indices = @transform_1, window_bounds = array<i64: 8, 1>}, {pipeline_mode = #tpu.pipeline_mode<synchronous>, transform_indices = @transform_2, window_bounds = array<i64: 8, 1>}, {transform_indices = @transform_3, window_bounds = array<i64: 1, 8, 256>}]} {
    %c0 = arith.constant 0 : index
    %c0_0 = arith.constant 0 : index
    %c0_1 = arith.constant 0 : index
    %0 = vector.load %arg1[%c0, %c0_0, %c0_1] : memref<1x8x256xf32, #tpu.memory_space<vmem>>, vector<1x8x256xf32>
    %c0_2 = arith.constant 0 : index
    %c0_3 = arith.constant 0 : index
    %1 = vector.load %arg2[%c0_2, %c0_3] : memref<8x1xf32, #tpu.memory_space<vmem>>, vector<8x1xf32>
    %2 = vector.shape_cast %1 : vector<8x1xf32> to vector<1x8x1xf32>
    %3 = vector.broadcast %2 : vector<1x8x1xf32> to vector<1x8x256xf32>
    %4 = arith.mulf %0, %3 : vector<1x8x256xf32>
    %c0_4 = arith.constant 0 : index
    %c0_5 = arith.constant 0 : index
    %5 = vector.load %arg3[%c0_4, %c0_5] : memref<8x1xf32, #tpu.memory_space<vmem>>, vector<8x1xf32>
    %6 = vector.shape_cast %5 : vector<8x1xf32> to vector<1x8x1xf32>
    %7 = vector.broadcast %6 : vector<1x8x1xf32> to vector<1x8x256xf32>
    %8 = arith.addf %4, %7 : vector<1x8x256xf32>
    %cst = arith.constant 0.000000e+00 : f32
    %9 = vector.broadcast %cst : f32 to vector<1x8x256xf32>
    %10 = arith.cmpf oge, %8, %9 : vector<1x8x256xf32>
    %cst_6 = arith.constant 5.000000e-02 : f32
    %11 = vector.broadcast %cst_6 : f32 to vector<1x8x256xf32>
    %12 = arith.mulf %11, %8 : vector<1x8x256xf32>
    %13 = arith.select %10, %8, %12 : vector<1x8x256xi1>, vector<1x8x256xf32>
    %c0_7 = arith.constant 0 : index
    %c0_8 = arith.constant 0 : index
    %c0_9 = arith.constant 0 : index
    %14 = vector.load %arg4[%c0_7, %c0_8, %c0_9] : memref<1x8x256xf32, #tpu.memory_space<vmem>>, vector<1x8x256xf32>
    tpu.vector_store %arg4[%c0_7, %c0_8, %c0_9], %13 {strides = array<i32>} : memref<1x8x256xf32, #tpu.memory_space<vmem>>, vector<1x8x256xf32>,
    return
  }
  func.func @transform_0(%arg0: i32) -> (i32, i32, i32) {
    %c0_i32 = arith.constant 0 : i32
    %c0_i32_0 = arith.constant 0 : i32
    %c0_i32_1 = arith.constant 0 : i32
    return %arg0, %c0_i32, %c0_i32_0 : i32, i32, i32
  }
  func.func @transform_1(%arg0: i32) -> (i32, i32) {
    %c0_i32 = arith.constant 0 : i32
    %c0_i32_0 = arith.constant 0 : i32
    %c0_i32_1 = arith.constant 0 : i32
    return %c0_i32, %c0_i32_0 : i32, i32
  }
  func.func @transform_2(%arg0: i32) -> (i32, i32) {
    %c0_i32 = arith.constant 0 : i32
    %c0_i32_0 = arith.constant 0 : i32
    %c0_i32_1 = arith.constant 0 : i32
    return %c0_i32, %c0_i32_0 : i32, i32
  }
  func.func @transform_3(%arg0: i32) -> (i32, i32, i32) {
    %c0_i32 = arith.constant 0 : i32
    %c0_i32_0 = arith.constant 0 : i32
    %c0_i32_1 = arith.constant 0 : i32
    return %arg0, %c0_i32, %c0_i32_0 : i32, i32, i32
  }
}

</mosaic_0001>

<bundles_post_ra>
// kernel: conv_block_forward.5
= control target key start
LH: loop header
LB: loop body
LE: loop exit
PB: predicated region body
PF: predicated region fallthrough
CT: control target
= control target key end

     0   :  { %s304_s12 = smov 0   ;;  %s327_s0 = inlined_call_operand.vmem [shape: f32[2,8,256], index: 0, kind: input, shape index: {}]   ;;  %s328_s1 = inlined_call_operand.vmem [shape: f32[8,1], index: 1, kind: input, shape index: {}]   ;;  %s329_s2 = inlined_call_operand.vmem [shape: f32[8,1], index: 2, kind: input, shape index: {}]   ;;  %s330_s3 = inlined_call_operand.vmem [shape: f32[2,8,256], index: 3, kind: output, shape index: {}]  }
   0x1 LB: > { %s252_s13 = sadd.s32 4294967295, %s281_s12   ;;  %p256_p0 = scmp.ge.s32.totalorder %s281_s12, 1  ;;  %s281_s12 = sphi %s304_s12, %s13_s12  }
   0x2   : > { %p137_p1 = scmp.lt.s32.totalorder %s281_s12, 3 }
   0x4   : > { %p138_p2 = pnand %p256_p0, %p137_p1 }
   0x5   : > { %p161_p3 = scmp.lt.s32.totalorder (!%p138_p2), %s252_s13, 1 }
   0x6   : > { %141 = sbr.rel (%p138_p2) target bundleno = 147 (0x93), region = 32 }
   0xb   : > { %v173_v0 = vld [vmem:[%s328_s1] sm:$0xff]  ;;  %v283_v1 = vmov 0   ;;  %s332_s13 = smov (!%p161_p3, %s252_s13), 1 }
   0xc   : > { %274 = vset.pattern.permute.xlu0 %v283_v1  ;;  %v181_v2 = vld [vmem:[%s329_s2] sm:$0xff]  ;;  %s263_s18 = sshll.u32 %s332_s13, 4 }
   0xd   : > { %176 = vperm.xlu0 %274, %v173_v0   ;;  %s165_s21 = scalar_lea.vmem %s327_s0, %s263_s18  ;;  %s170_s24 = scalar_lea.vmem %s330_s3, %s263_s18 }
   0xe   : > { %v171_v4 = vld [vmem:[%s165_s21] sm:$0xff]  ;;  %v172_v5 = vld [vmem:[%s165_s21 + $0x8] sm:$0xff] }
  0x11   : > { %184 = vperm.xlu0 %274, %v181_v2  }
  0x88   : > { %v177_v3 = vpop.permute.xlu0 %176 }
  0x89   : > { %v179_v6 = vmul.f32 %v177_v3, %v171_v4  ;;  %v180_v7 = vmul.f32 %v177_v3, %v172_v5 }
  0x8c   : > { %v185_v8 = vpop.permute.xlu0 %184 }
  0x8d   : > { %v187_v9 = vadd.f32 %v185_v8, %v179_v6  ;;  %v188_v10 = vadd.f32 %v185_v8, %v180_v7 }
  0x8f   : > { %vm189_vm0 = vcmp.ge.f32.partialorder %v187_v9, 0.0  ;;  %vm190_vm1 = vcmp.ge.f32.partialorder %v188_v10, 0.0  ;;  %v191_v11 = vmul.f32 0.05, %v187_v9  ;;  %v192_v12 = vmul.f32 0.05, %v188_v10 }
  0x91   : > { %v193_v13 = vsel %vm189_vm0, %v187_v9, %v191_v11  ;;  %v194_v14 = vsel %vm190_vm1, %v188_v10, %v192_v12 }
  0x92   : > { %195 = vst [vmem:[%s170_s24] sm:$0xff] %v193_v13  ;;  %196 = vst [vmem:[%s170_s24 + $0x8] sm:$0xff] %v194_v14 }
  0x93 PF: > { %s13_s12 = sadd.s32 1, %s281_s12  }
  0x94   : > { %p10_p4 = scmp.ge.s32.totalorder %s13_s12, 4  }
  0x96   :  { %12 = sbr.rel (!%p10_p4) target bundleno = 1 (0x1), region = 62 }

// kernel: conv_block_forward.4
= control target key start
LH: loop header
LB: loop body
LE: loop exit
PB: predicated region body
PF: predicated region fallthrough
CT: control target
= control target key end

     0   :  { %s722_s18 = smov 0   ;;  %s821_s0 = inlined_call_operand.vmem [shape: f32[2,8,256], index: 0, kind: input, shape index: {}]   ;;  %s822_s1 = inlined_call_operand.vmem [shape: f32[8,72], index: 1, kind: input, shape index: {}]   ;;  %s823_s2 = inlined_call_operand.vmem [shape: f32[8,1], index: 2, kind: input, shape index: {}]   ;;  %s824_s3 = inlined_call_operand.vmem [shape: f32[8,1], index: 3, kind: input, shape index: {}]   ;;  %s825_s4 = inlined_call_operand.vmem [shape: f32[2,8,256], index: 4, kind: output, shape index: {0}]   ;;  %s826_s5 = inlined_call_operand.vmem [shape: f32[2,8,2], index: 5, kind: output, shape index: {1}]  }
   0x1 LB: > { %s626_s19 = sadd.s32 4294967295, %s679_s18   ;;  %p630_p0 = scmp.ge.s32.totalorder %s679_s18, 1  ;;  %s679_s18 = sphi %s722_s18, %s16_s18  }
   0x2   : > { %p190_p1 = scmp.lt.s32.totalorder %s679_s18, 3 }
   0x4   : > { %p191_p2 = pnand %p630_p0, %p190_p1 }
   0x5   : > { %p222_p3 = scmp.lt.s32.totalorder (!%p191_p2), %s626_s19, 1  ;;  %s682_s28 = smov (!%p191_p2), 17  }
   0x6   : > { %194 = sbr.rel (%p191_p2) target bundleno = 768 (0x300), region = 36  ;;  %s683_s29 = smov (!%p191_p2), 94  }
   0x7   : > { %s684_s30 = smov (!%p191_p2), 95   ;;  %s685_s6 = smov (!%p191_p2), 96  }
   0x8   : > { %s686_s7 = smov (!%p191_p2), 110   ;;  %s687_s8 = smov (!%p191_p2), 111  }
   0x9   : > { %s688_s9 = smov (!%p191_p2), 112   ;;  %s690_s10 = smov (!%p191_p2), 126  }
   0xa   : > { %s691_s11 = smov (!%p191_p2), 127  }
   0xb   : > { %v238_v0 = vld [vmem:[%s823_s2] sm:$0xff]  ;;  %v681_v1 = vmov 0   ;;  %s836_s19 = smov (!%p222_p3, %s626_s19), 1  ;;  %vm297_vm2 = vcmask 138240   ;;  %v689_v20 = vmov 0.0   ;;  %v260_v21 = vlaneseq }
   0xc   : > { %672 = vset.pattern.permute.xlu0 %v681_v1  ;;  %v246_v2 = vld [vmem:[%s824_s3] sm:$0xff]  ;;  %s639_s24 = sshll.u32 %s836_s19, 4  ;;  %519 = vmatprep.mubr.f32.mxu0 %v689_v20  ;;  %vm423_vm3 = vcmask 769024   ;;  %vm410_vm6 = vcmask 777216   ;;  %vm395_vm7 = vcmask 785408   ;;  %vm380_vm10 = vcmask 900096  }
   0xd   : > { %241 = vperm.xlu0 %672, %v238_v0   ;;  %s226_s27 = scalar_lea.vmem %s821_s0, %s639_s24  ;;  %v261_v22 = vand.u32 127, %v260_v21  ;;  %vm367_vm11 = vcmask 908288   ;;  %vm352_vm12 = vcmask 916480   ;;  %vm337_vm13 = vcmask 1031168   ;;  %s231_s16 = scalar_lea.vmem %s825_s4, %s639_s24 }
   0xe   : > { %v236_v4 = vld [vmem:[%s226_s27] sm:$0xff]  ;;  %v237_v5 = vld [vmem:[%s226_s27 + $0x8] sm:$0xff]  ;;  %vm320_vm14 = vcmask 1039360   ;;  %vm451_vm15 = vcmask 588800   ;;  %s635_s17 = sshll.u32 %s836_s19, 3 }
   0xf   : > { %v262_v23 = vadd.s32 128, %v261_v22  ;;  %v267_v26 = vand.u32 15, %v261_v22  ;;  %s235_s22 = scalar_lea.vmem %s826_s5, %s635_s17 }
  0x11   : > { %249 = vperm.xlu0 %672, %v246_v2   ;;  %v274_v24 = vand.u32 15, %v262_v23  ;;  %vm770_vm5 = vcmp.ne.s32.totalorder %v267_v26, 15  ;;  %vm782_vm9 = vcmp.ne.s32.totalorder %v267_v26, 0 }
  0x13   : > { %vm764_vm4 = vcmp.ne.s32.totalorder %v274_v24, 15  ;;  %vm776_vm8 = vcmp.ne.s32.totalorder %v274_v24, 0 }
  0x88   : > { %v242_v3 = vpop.permute.xlu0 %241 }
  0x89   : > { %v244_v6 = vmul.f32 %v242_v3, %v236_v4  ;;  %v245_v7 = vmul.f32 %v242_v3, %v237_v5 }
  0x8c   : > { %v250_v8 = vpop.permute.xlu0 %249 }
  0x8d   : > { %v252_v9 = vadd.f32 %v250_v8, %v244_v6  ;;  %v253_v10 = vadd.f32 %v250_v8, %v245_v7  ;;  %v432_v6 = vld [vmem:[%s822_s1] sm:$0xff] }
  0x8f   : > { %vm254_vm0 = vcmp.ge.f32.partialorder %v252_v9, 0.0  ;;  %v256_v11 = vmul.f32 0.05, %v252_v9  ;;  %v257_v13 = vmul.f32 0.05, %v253_v10  ;;  %vm255_vm1 = vcmp.ge.f32.partialorder %v253_v10, 0.0 }
  0x91   : > { %v258_v12 = vsel %vm254_vm0, %v252_v9, %v256_v11  ;;  %v259_v14 = vsel %vm255_vm1, %v253_v10, %v257_v13  ;;  %vm529_vm0 = vcmask 7168   ;;  %vm536_vm1 = vcmask 15368  }
  0x92   : > { %293 = vrot.lane.b32.xlu1 %v258_v12, %s682_s28 }
  0x96   : > { %295 = vrot.lane.b32.xlu1 %v259_v14, %s682_s28 }
 0x104   : > { %v294_v15 = vpop.permute.xlu1 %293 }
 0x105   : > { %v747_v19 = vsel %vm297_vm2, 0.0, %v294_v15 }
 0x108   : > { %v296_v16 = vpop.permute.xlu1 %295 }
 0x109   : > { %v744_v17 = vsel %vm297_vm2, %v294_v15, %v296_v16  ;;  %v303_v18 = vsel %vm297_vm2, %v296_v16, 0.0 }
 0x10a   : > { %421 = vrot.lane.b32.xlu1 %v303_v18, %s683_s29  ;;  %419 = vrot.lane.b32.xlu0 %v744_v17, %s683_s29 }
 0x10e   : > { %406 = vrot.lane.b32.xlu1 %v744_v17, %s684_s30  ;;  %417 = vrot.lane.b32.xlu0 %v747_v19, %s683_s29 }
 0x112   : > { %404 = vrot.lane.b32.xlu1 %v747_v19, %s684_s30  ;;  %408 = vrot.lane.b32.xlu0 %v303_v18, %s684_s30 }
 0x116   : > { %393 = vrot.lane.b32.xlu1 %v303_v18, %s685_s6  ;;  %391 = vrot.lane.b32.xlu0 %v744_v17, %s685_s6 }
 0x11a   : > { %376 = vrot.lane.b32.xlu1 %v744_v17, %s686_s7  ;;  %389 = vrot.lane.b32.xlu0 %v747_v19, %s685_s6 }
 0x11e   : > { %374 = vrot.lane.b32.xlu1 %v747_v19, %s686_s7  ;;  %378 = vrot.lane.b32.xlu0 %v303_v18, %s686_s7 }
 0x122   : > { %365 = vrot.lane.b32.xlu1 %v303_v18, %s687_s8  ;;  %363 = vrot.lane.b32.xlu0 %v744_v17, %s687_s8 }
 0x126   : > { %348 = vrot.lane.b32.xlu1 %v744_v17, %s688_s9  ;;  %361 = vrot.lane.b32.xlu0 %v747_v19, %s687_s8 }
 0x12a   : > { %346 = vrot.lane.b32.xlu1 %v747_v19, %s688_s9  ;;  %350 = vrot.lane.b32.xlu0 %v303_v18, %s688_s9 }
 0x12e   : > { %335 = vrot.lane.b32.xlu1 %v303_v18, %s690_s10  ;;  %333 = vrot.lane.b32.xlu0 %v744_v17, %s690_s10 }
 0x132   : > { %316 = vrot.lane.b32.xlu1 %v744_v17, %s691_s11  ;;  %331 = vrot.lane.b32.xlu0 %v747_v19, %s690_s10 }
 0x136   : > { %314 = vrot.lane.b32.xlu1 %v747_v19, %s691_s11  ;;  %318 = vrot.lane.b32.xlu0 %v303_v18, %s691_s11 }
 0x17c   : > { %v422_v27 = vpop.permute.xlu1 %421  ;;  %v420_v28 = vpop.permute.xlu0 %419 }
 0x17d   : > { %v425_v29 = vsel %vm423_vm3, %v420_v28, %v422_v27 }
 0x17e   : > { %641 = vmatprep.subr.msk.mxu0 %vm764_vm4, %v425_v29 }
 0x180   : > { %v407_v31 = vpop.permute.xlu1 %406  ;;  %v418_v32 = vpop.permute.xlu0 %417 }
 0x181   : > { %v424_v33 = vsel %vm423_vm3, %v418_v32, %v420_v28 }
 0x182   : > { %642 = vmatpush1.msk.msra.mxu0 %vm770_vm5, %v424_v33 }
 0x184   : > { %v405_v34 = vpop.permute.xlu1 %404  ;;  %v409_v35 = vpop.permute.xlu0 %408 }
 0x185   : > { %v412_v36 = vsel %vm410_vm6, %v407_v31, %v409_v35  ;;  %v411_v37 = vsel %vm410_vm6, %v405_v34, %v407_v31 }
 0x186   : > { %471 = vmatprep.subr.mxu0 %v412_v36 }
 0x187   : > { %472 = vmatpush1.msra.mxu0 %v411_v37 }
 0x188   : > { %v394_v39 = vpop.permute.xlu1 %393  ;;  %v392_v40 = vpop.permute.xlu0 %391 }
 0x189   : > { %v397_v41 = vsel %vm395_vm7, %v392_v40, %v394_v39 }
 0x18a   : > { %643 = vmatprep.subr.msk.mxu0 %vm776_vm8, %v397_v41 }
 0x18c   : > { %v377_v43 = vpop.permute.xlu1 %376  ;;  %v390_v44 = vpop.permute.xlu0 %389 }
 0x18d   : > { %v396_v45 = vsel %vm395_vm7, %v390_v44, %v392_v40 }
 0x18e   : > { %644 = vmatpush1.msk.msra.mxu0 %vm782_vm9, %v396_v45 }
 0x190   : > { %v375_v46 = vpop.permute.xlu1 %374  ;;  %v379_v47 = vpop.permute.xlu0 %378 }
 0x191   : > { %v381_v48 = vsel %vm380_vm10, %v375_v46, %v377_v43  ;;  %v382_v49 = vsel %vm380_vm10, %v377_v43, %v379_v47 }
 0x192   : > { %645 = vmatprep.subr.msk.mxu0 %vm764_vm4, %v382_v49 }
 0x193   : > { %646 = vmatpush1.msk.msra.mxu0 %vm770_vm5, %v381_v48 }
 0x194   : > { %v366_v50 = vpop.permute.xlu1 %365  ;;  %v364_v51 = vpop.permute.xlu0 %363 }
 0x195   : > { %v369_v52 = vsel %vm367_vm11, %v364_v51, %v366_v50 }
 0x196   : > { %477 = vmatprep.subr.mxu0 %v369_v52 }
 0x198   : > { %v349_v53 = vpop.permute.xlu1 %348  ;;  %v362_v54 = vpop.permute.xlu0 %361 }
 0x199   : > { %v368_v55 = vsel %vm367_vm11, %v362_v54, %v364_v51 }
 0x19a   : > { %478 = vmatpush1.msra.mxu0 %v368_v55 }
 0x19c   : > { %v347_v56 = vpop.permute.xlu1 %346  ;;  %v351_v57 = vpop.permute.xlu0 %350 }
 0x19d   : > { %v353_v58 = vsel %vm352_vm12, %v347_v56, %v349_v53  ;;  %v354_v59 = vsel %vm352_vm12, %v349_v53, %v351_v57 }
 0x19e   : > { %647 = vmatprep.subr.msk.mxu0 %vm776_vm8, %v354_v59 }
 0x19f   : > { %648 = vmatpush1.msk.msra.mxu0 %vm782_vm9, %v353_v58 }
 0x1a0   : > { %v336_v60 = vpop.permute.xlu1 %335  ;;  %v334_v61 = vpop.permute.xlu0 %333 }
 0x1a1   : > { %v339_v62 = vsel %vm337_vm13, %v334_v61, %v336_v60 }
 0x1a2   : > { %649 = vmatprep.subr.msk.mxu0 %vm764_vm4, %v339_v62 }
 0x1a4   : > { %v317_v63 = vpop.permute.xlu1 %316  ;;  %v332_v0 = vpop.permute.xlu0 %331 }
 0x1a5   : > { %v338_v1 = vsel %vm337_vm13, %v332_v0, %v334_v61 }
 0x1a6   : > { %650 = vmatpush1.msk.msra.mxu0 %vm770_vm5, %v338_v1 }
 0x1a8   : > { %v315_v2 = vpop.permute.xlu1 %314  ;;  %v319_v3 = vpop.permute.xlu0 %318 }
 0x1a9   : > { %v322_v4 = vsel %vm320_vm14, %v317_v63, %v319_v3  ;;  %v321_v5 = vsel %vm320_vm14, %v315_v2, %v317_v63 }
 0x1aa   : > { %483 = vmatprep.subr.mxu0 %v322_v4 }
 0x1ab   : > { %484 = vmatpush1.msra.mxu0 %v321_v5 }
 0x1ac   : > { %651 = vmatprep.subr.msk.mxu0 %vm776_vm8, %v744_v17 }
 0x1ad   : > { %652 = vmatpush1.msk.msra.mxu0 %vm782_vm9, %v747_v19 }
 0x1ae   : > { %636 = vmatmul.mubr.msk.f32.vlgmr.msra.gmra.mxu0 %vm451_vm15, %v432_v6 }
 0x26e   : > { %v521_v7 = vpop.f32.mrf.mxu0 }
 0x26f   : > { %538 = vst [vmem:[%s231_s16] sm:$0xff] %v521_v7  ;;  %v531_v11 = vmul.f32 %v521_v7, %v521_v7 }
 0x270   : > { %v523_v8 = vpop.f32.mrf.mxu0 }
 0x271   : > { %v532_v9 = vmul.f32 %v523_v8, %v523_v8  ;;  %539 = vst [vmem:[%s231_s16 + $0x8] sm:$0xff] %v523_v8  ;;  %v526_v10 = vadd.f32 %v523_v8, %v521_v7 }
 0x273   : > { %527 = vadd.xlane.f32.xlu0 %v526_v10  ;;  %v533_v12 = vadd.f32 %v532_v9, %v531_v11 }
 0x275   : > { %534 = vadd.xlane.f32.xlu1 %v533_v12 }
 0x2fc   : > { %v528_v13 = vpop.xlane.xlu0 %527 }
 0x2fd   : > { %530 = vst.msk [vmem:[%s235_s22] sm:$0xff] %vm529_vm0, %v528_v13 }
 0x2fe   : > { %v535_v14 = vpop.xlane.xlu1 %534 }
 0x2ff   : > { %537 = vst.msk [vmem:[%s235_s22] sm:$0xff] %vm536_vm1, %v535_v14 }
 0x300 PF: > { %s16_s18 = sadd.s32 1, %s679_s18  }
 0x301   : > { %p13_p4 = scmp.ge.s32.totalorder %s16_s18, 4  }
 0x303   :  { %15 = sbr.rel (!%p13_p4) target bundleno = 1 (0x1), region = 78 }

// kernel: conv_block_forward.3
= control target key start
LH: loop header
LB: loop body
LE: loop exit
PB: predicated region body
PF: predicated region fallthrough
CT: control target
= control target key end

     0   :  { %s703_s18 = smov 0   ;;  %s792_s0 = inlined_call_operand.vmem [shape: f32[2,4,256], index: 0, kind: input, shape index: {}]   ;;  %s793_s1 = inlined_call_operand.vmem [shape: f32[8,72], index: 1, kind: input, shape index: {}]   ;;  %s794_s2 = inlined_call_operand.vmem [shape: f32[4,1], index: 2, kind: input, shape index: {}]   ;;  %s795_s3 = inlined_call_operand.vmem [shape: f32[4,1], index: 3, kind: input, shape index: {}]   ;;  %s796_s4 = inlined_call_operand.vmem [shape: f32[2,8,256], index: 4, kind: output, shape index: {0}]   ;;  %s797_s5 = inlined_call_operand.vmem [shape: f32[2,8,2], index: 5, kind: output, shape index: {1}]  }
   0x1 LB: > { %s621_s2 = sadd.s32 4294967295, %s661_s18   ;;  %p625_p0 = scmp.ge.s32.totalorder %s661_s18, 1  ;;  %s661_s18 = sphi %s703_s18, %s16_s18  }
   0x2   : > { %p190_p1 = scmp.lt.s32.totalorder %s661_s18, 3 }
   0x4   : > { %p191_p2 = pnand %p625_p0, %p190_p1 }
   0x5   : > { %p711_p3 = scmp.lt.s32.totalorder (!%p191_p2), %s621_s2, 1  ;;  %s664_s23 = smov (!%p191_p2), 17  }
   0x6   : > { %194 = sbr.rel (%p191_p2) target bundleno = 644 (0x284), region = 36  ;;  %s665_s24 = smov (!%p191_p2), 95  }
   0x7   : > { %s666_s25 = smov (!%p191_p2), 94   ;;  %s667_s26 = smov (!%p191_p2), 110  }
   0x8   : > { %s668_s27 = smov (!%p191_p2), 96   ;;  %s669_s28 = smov (!%p191_p2), 112  }
   0x9   : > { %s670_s29 = smov (!%p191_p2), 111   ;;  %s671_s30 = smov (!%p191_p2), 126  }
   0xa   : > { %s672_s6 = smov (!%p191_p2), 127  }
   0xb   : > { %v663_v0 = vmov 0.0   ;;  %s808_s2 = smov (!%p711_p3, %s621_s2), 1  ;;  %v237_v3 = vlaneseq  ;;  %vm274_vm0 = vcmask 138240   ;;  %vm418_vm3 = vcmask 769024  }
   0xc   : > { %297 = vst [vmem:[#allocation2 + $0x68] sm:$0xff] %v663_v0  ;;  %281 = vst [vmem:[#allocation2] sm:$0xff] %v663_v0  ;;  %514 = vmatprep.mubr.f32.mxu0 %v663_v0  ;;  %s634_s19 = sshll.u32 %s808_s2, 3  ;;  %vm405_vm6 = vcmask 777216   ;;  %vm390_vm7 = vcmask 785408   ;;  %vm375_vm8 = vcmask 900096  }
   0xd   : > { %282 = vst [vmem:[#allocation2 + $0x38] sm:$0xff] %v663_v0  ;;  %283 = vst [vmem:[#allocation2 + $0x78] sm:$0xff] %v663_v0  ;;  %s226_s22 = scalar_lea.vmem %s792_s0, %s634_s19  ;;  %v238_v4 = vand.u32 127, %v237_v3  ;;  %vm362_vm9 = vcmask 908288   ;;  %vm347_vm10 = vcmask 916480   ;;  %vm332_vm11 = vcmask 1031168   ;;  %s235_s15 = scalar_lea.vmem %s797_s5, %s634_s19 }
   0xe   : > { %284 = vst [vmem:[#allocation2 + $0x58] sm:$0xff] %v663_v0  ;;  %285 = vst [vmem:[#allocation2 + $0x20] sm:$0xff] %v663_v0  ;;  %v236_v1 = vld [vmem:[%s226_s22] sm:$0xff]  ;;  %vm315_vm12 = vcmask 1039360   ;;  %vm446_vm13 = vcmask 588800   ;;  %s635_s9 = sshll.u32 %s808_s2, 4 }
   0xf   : > { %286 = vst [vmem:[#allocation2 + $0x8] sm:$0xff] %v663_v0  ;;  %287 = vst [vmem:[#allocation2 + $0x70] sm:$0xff] %v663_v0  ;;  %270 = vrot.lane.b32.xlu0 %v236_v1, %s664_s23  ;;  %v269_v2 = vcombine.high %v236_v1, %v236_v1  ;;  %v244_v5 = vand.u32 15, %v238_v4  ;;  %v239_v6 = vadd.s32 128, %v238_v4  ;;  %s231_s12 = scalar_lea.vmem %s796_s4, %s635_s9  ;;  %vm524_vm14 = vcmask 7168  }
  0x10   : > { %288 = vst [vmem:[#allocation2 + $0x80] sm:$0xff] %v663_v0  ;;  %289 = vst [vmem:[#allocation2 + $0x88] sm:$0xff] %v663_v0  ;;  %vm531_vm15 = vcmask 15368  }
  0x11   : > { %290 = vst [vmem:[#allocation2 + $0x40] sm:$0xff] %v663_v0  ;;  %291 = vst [vmem:[#allocation2 + $0x50] sm:$0xff] %v663_v0  ;;  %v251_v7 = vand.u32 15, %v239_v6  ;;  %vm725_vm1 = vcmp.ne.s32.totalorder %v244_v5, 0  ;;  %vm740_vm4 = vcmp.ne.s32.totalorder %v244_v5, 15 }
  0x12   : > { %292 = vst [vmem:[#allocation2 + $0x28] sm:$0xff] %v663_v0  ;;  %293 = vst [vmem:[#allocation2 + $0x10] sm:$0xff] %v663_v0 }
  0x13   : > { %294 = vst [vmem:[#allocation2 + $0x48] sm:$0xff] %v663_v0  ;;  %295 = vst [vmem:[#allocation2 + $0x30] sm:$0xff] %v663_v0  ;;  %272 = vrot.lane.b32.xlu0 %v269_v2, %s664_s23  ;;  %vm732_vm2 = vcmp.ne.s32.totalorder %v251_v7, 0  ;;  %vm748_vm5 = vcmp.ne.s32.totalorder %v251_v7, 15 }
  0x14   : > { %296 = vst [vmem:[#allocation2 + $0x18] sm:$0xff] %v663_v0  ;;  %298 = vst [vmem:[#allocation2 + $0x60] sm:$0xff] %v663_v0 }
  0x81   : > { %v271_v9 = vpop.permute.xlu0 %270 }
  0x82   : > { %v279_v10 = vsel %vm274_vm0, 0.0, %v271_v9 }
  0x83   : > { %399 = vrot.lane.b32.xlu1 %v279_v10, %s665_s24  ;;  %412 = vrot.lane.b32.xlu0 %v279_v10, %s666_s25  ;;  %v303_v11 = vsel %vm725_vm1, %v279_v10, 0.0 }
  0x84   : > { %305 = vst [vmem:[#allocation2] sm:$0xf] %v303_v11 }
  0x85   : > { %v273_v13 = vpop.permute.xlu0 %272 }
  0x86   : > { %v275_v14 = vsel %vm274_vm0, %v271_v9, %v273_v13  ;;  %v280_v16 = vsel %vm274_vm0, %v273_v13, 0.0 }
  0x87   : > { %369 = vrot.lane.b32.xlu1 %v279_v10, %s667_s26  ;;  %384 = vrot.lane.b32.xlu0 %v279_v10, %s668_s27  ;;  %v304_v15 = vsel %vm732_vm2, %v275_v14, 0.0 }
  0x88   : > { %306 = vst [vmem:[#allocation2 + $0x38] sm:$0xf] %v304_v15 }
  0x8b   : > { %341 = vrot.lane.b32.xlu1 %v279_v10, %s669_s28  ;;  %356 = vrot.lane.b32.xlu0 %v279_v10, %s670_s29  ;;  %v428_v23 = vld [vmem:[#allocation2] sm:$0xff] }
  0x8f   : > { %326 = vrot.lane.b32.xlu0 %v279_v10, %s671_s30  ;;  %414 = vrot.lane.b32.xlu1 %v275_v14, %s666_s25 }
  0x93   : > { %403 = vrot.lane.b32.xlu0 %v280_v16, %s665_s24  ;;  %416 = vrot.lane.b32.xlu1 %v280_v16, %s666_s25 }
  0x97   : > { %388 = vrot.lane.b32.xlu0 %v280_v16, %s668_s27  ;;  %401 = vrot.lane.b32.xlu1 %v275_v14, %s665_s24 }
  0x9b   : > { %373 = vrot.lane.b32.xlu0 %v280_v16, %s667_s26  ;;  %386 = vrot.lane.b32.xlu1 %v275_v14, %s668_s27 }
  0x9f   : > { %358 = vrot.lane.b32.xlu0 %v275_v14, %s670_s29  ;;  %371 = vrot.lane.b32.xlu1 %v275_v14, %s667_s26 }
  0xa3   : > { %343 = vrot.lane.b32.xlu0 %v275_v14, %s669_s28  ;;  %360 = vrot.lane.b32.xlu1 %v280_v16, %s670_s29 }
  0xa7   : > { %328 = vrot.lane.b32.xlu0 %v275_v14, %s671_s30  ;;  %345 = vrot.lane.b32.xlu1 %v280_v16, %s669_s28 }
  0xab   : > { %313 = vrot.lane.b32.xlu0 %v280_v16, %s672_s6  ;;  %330 = vrot.lane.b32.xlu1 %v280_v16, %s671_s30 }
  0xaf   : > { %311 = vrot.lane.b32.xlu1 %v275_v14, %s672_s6 }
  0xb3   : > { %309 = vrot.lane.b32.xlu1 %v279_v10, %s672_s6 }
  0xf5   : > { %v400_v17 = vpop.permute.xlu1 %399  ;;  %v413_v18 = vpop.permute.xlu0 %412 }
  0xf9   : > { %v370_v19 = vpop.permute.xlu1 %369  ;;  %v385_v20 = vpop.permute.xlu0 %384 }
  0xfd   : > { %v342_v21 = vpop.permute.xlu1 %341  ;;  %v357_v22 = vpop.permute.xlu0 %356 }
 0x101   : > { %v415_v24 = vpop.permute.xlu1 %414  ;;  %v744_v25 = vpop.permute.xlu0 %326 }
 0x102   : > { %v419_v26 = vsel %vm418_vm3, %v413_v18, %v415_v24 }
 0x103   : > { %v423_v27 = vsel %vm740_vm4, %v419_v26, 0.0 }
 0x104   : > { %425 = vst [vmem:[#allocation2 + $0x68] sm:$0xf] %v423_v27 }
 0x105   : > { %v417_v29 = vpop.permute.xlu1 %416  ;;  %v404_v30 = vpop.permute.xlu0 %403 }
 0x106   : > { %v420_v31 = vsel %vm418_vm3, %v415_v24, %v417_v29 }
 0x107   : > { %v424_v32 = vsel %vm748_vm5, %v420_v31, 0.0 }
 0x108   : > { %426 = vst [vmem:[#allocation2 + $0x60] sm:$0xf] %v424_v32 }
 0x109   : > { %v402_v33 = vpop.permute.xlu1 %401  ;;  %v389_v34 = vpop.permute.xlu0 %388 }
 0x10a   : > { %v406_v35 = vsel %vm405_vm6, %v400_v17, %v402_v33  ;;  %v407_v36 = vsel %vm405_vm6, %v402_v33, %v404_v30 }
 0x10b   : > { %410 = vst [vmem:[#allocation2 + $0x30] sm:$0xf] %v406_v35  ;;  %411 = vst [vmem:[#allocation2 + $0x18] sm:$0xf] %v407_v36  ;;  %v444_v44 = vld [vmem:[#allocation2 + $0x68] sm:$0xff] }
 0x10d   : > { %v387_v37 = vpop.permute.xlu1 %386  ;;  %v374_v38 = vpop.permute.xlu0 %373 }
 0x10e   : > { %v391_v39 = vsel %vm390_vm7, %v385_v20, %v387_v37  ;;  %v392_v40 = vsel %vm390_vm7, %v387_v37, %v389_v34 }
 0x10f   : > { %v395_v41 = vsel %vm725_vm1, %v391_v39, 0.0  ;;  %v396_v42 = vsel %vm732_vm2, %v392_v40, 0.0  ;;  %v445_v43 = vld [vmem:[#allocation2 + $0x60] sm:$0xff] }
 0x110   : > { %397 = vst [vmem:[#allocation2 + $0x10] sm:$0xf] %v395_v41  ;;  %398 = vst [vmem:[#allocation2 + $0x48] sm:$0xf] %v396_v42  ;;  %464 = vmatprep.subr.mxu0 %v445_v43 }
 0x111   : > { %v372_v45 = vpop.permute.xlu1 %371  ;;  %465 = vmatpush1.msra.mxu0 %v444_v44  ;;  %v359_v46 = vpop.permute.xlu0 %358 }
 0x112   : > { %v376_v47 = vsel %vm375_vm8, %v370_v19, %v372_v45  ;;  %v377_v48 = vsel %vm375_vm8, %v372_v45, %v374_v38  ;;  %v363_v49 = vsel %vm362_vm9, %v357_v22, %v359_v46  ;;  %v443_v50 = vld [vmem:[#allocation2 + $0x18] sm:$0xff]  ;;  %v442_v51 = vld [vmem:[#allocation2 + $0x30] sm:$0xff]  ;;  %v427_v22 = vld [vmem:[%s793_s1] sm:$0xff] }
 0x113   : > { %v380_v52 = vsel %vm740_vm4, %v376_v47, 0.0  ;;  %v381_v53 = vsel %vm748_vm5, %v377_v48, 0.0  ;;  %367 = vst [vmem:[#allocation2 + $0x88] sm:$0xf] %v363_v49  ;;  %466 = vmatprep.subr.mxu0 %v443_v50 }
 0x114   : > { %382 = vst [vmem:[#allocation2 + $0x50] sm:$0xf] %v380_v52  ;;  %383 = vst [vmem:[#allocation2 + $0x28] sm:$0xf] %v381_v53  ;;  %467 = vmatpush1.msra.mxu0 %v442_v51 }
 0x115   : > { %v361_v54 = vpop.permute.xlu1 %360  ;;  %v344_v55 = vpop.permute.xlu0 %343 }
 0x116   : > { %v364_v56 = vsel %vm362_vm9, %v359_v46, %v361_v54  ;;  %v348_v57 = vsel %vm347_vm10, %v342_v21, %v344_v55  ;;  %v429_v21 = vld [vmem:[#allocation2 + $0x38] sm:$0xff] }
 0x117   : > { %368 = vst [vmem:[#allocation2 + $0x40] sm:$0xf] %v364_v56  ;;  %v352_v58 = vsel %vm725_vm1, %v348_v57, 0.0  ;;  %v441_v59 = vld [vmem:[#allocation2 + $0x48] sm:$0xff]  ;;  %v440_v60 = vld [vmem:[#allocation2 + $0x10] sm:$0xff] }
 0x118   : > { %354 = vst [vmem:[#allocation2 + $0x70] sm:$0xf] %v352_v58  ;;  %468 = vmatprep.subr.mxu0 %v441_v59 }
 0x119   : > { %v346_v61 = vpop.permute.xlu1 %345  ;;  %469 = vmatpush1.msra.mxu0 %v440_v60  ;;  %v329_v62 = vpop.permute.xlu0 %328 }
 0x11a   : > { %v349_v63 = vsel %vm347_vm10, %v344_v55, %v346_v61  ;;  %v333_v0 = vsel %vm332_vm11, %v744_v25, %v329_v62  ;;  %v436_v9 = vld [vmem:[#allocation2 + $0x88] sm:$0xff] }
 0x11b   : > { %v353_v1 = vsel %vm732_vm2, %v349_v63, 0.0  ;;  %v337_v2 = vsel %vm740_vm4, %v333_v0, 0.0  ;;  %v439_v3 = vld [vmem:[#allocation2 + $0x28] sm:$0xff]  ;;  %v438_v4 = vld [vmem:[#allocation2 + $0x50] sm:$0xff] }
 0x11c   : > { %355 = vst [vmem:[#allocation2 + $0x80] sm:$0xf] %v353_v1  ;;  %339 = vst [vmem:[#allocation2 + $0x20] sm:$0xf] %v337_v2  ;;  %470 = vmatprep.subr.mxu0 %v439_v3 }
 0x11d   : > { %v331_v5 = vpop.permute.xlu1 %330  ;;  %471 = vmatpush1.msra.mxu0 %v438_v4  ;;  %v314_v10 = vpop.permute.xlu0 %313 }
 0x11e   : > { %v334_v6 = vsel %vm332_vm11, %v329_v62, %v331_v5  ;;  %v437_v7 = vld [vmem:[#allocation2 + $0x40] sm:$0xff] }
 0x11f   : > { %v338_v8 = vsel %vm748_vm5, %v334_v6, 0.0  ;;  %472 = vmatprep.subr.mxu0 %v437_v7  ;;  %v434_v14 = vld [vmem:[#allocation2 + $0x70] sm:$0xff] }
 0x120   : > { %340 = vst [vmem:[#allocation2 + $0x8] sm:$0xf] %v338_v8  ;;  %473 = vmatpush1.msra.mxu0 %v436_v9 }
 0x121   : > { %v312_v11 = vpop.permute.xlu1 %311 }
 0x122   : > { %v317_v12 = vsel %vm315_vm12, %v312_v11, %v314_v10 }
 0x123   : > { %321 = vst [vmem:[#allocation2 + $0x58] sm:$0xf] %v317_v12  ;;  %v435_v13 = vld [vmem:[#allocation2 + $0x80] sm:$0xff] }
 0x124   : > { %474 = vmatprep.subr.mxu0 %v435_v13  ;;  %v432_v18 = vld [vmem:[#allocation2 + $0x20] sm:$0xff] }
 0x125   : > { %v310_v15 = vpop.permute.xlu1 %309  ;;  %475 = vmatpush1.msra.mxu0 %v434_v14 }
 0x126   : > { %v316_v16 = vsel %vm315_vm12, %v310_v15, %v312_v11 }
 0x127   : > { %320 = vst [vmem:[#allocation2 + $0x78] sm:$0xf] %v316_v16  ;;  %v433_v17 = vld [vmem:[#allocation2 + $0x8] sm:$0xff] }
 0x128   : > { %476 = vmatprep.subr.mxu0 %v433_v17 }
 0x129   : > { %477 = vmatpush1.msra.mxu0 %v432_v18 }
 0x12a   : > { %v431_v19 = vld [vmem:[#allocation2 + $0x58] sm:$0xff] }
 0x12b   : > { %478 = vmatprep.subr.mxu0 %v431_v19 }
 0x12e   : > { %v430_v20 = vld [vmem:[#allocation2 + $0x78] sm:$0xff] }
 0x12f   : > { %479 = vmatpush1.msra.mxu0 %v430_v20 }
 0x130   : > { %480 = vmatprep.subr.mxu0 %v429_v21 }
 0x131   : > { %481 = vmatpush1.msra.mxu0 %v428_v23 }
 0x132   : > { %631 = vmatmul.mubr.msk.f32.vlgmr.msra.gmra.mxu0 %vm446_vm13, %v427_v22 }
 0x1f2   : > { %v516_v24 = vpop.f32.mrf.mxu0 }
 0x1f3   : > { %533 = vst [vmem:[%s231_s12] sm:$0xff] %v516_v24  ;;  %v526_v28 = vmul.f32 %v516_v24, %v516_v24 }
 0x1f4   : > { %v518_v25 = vpop.f32.mrf.mxu0 }
 0x1f5   : > { %v527_v26 = vmul.f32 %v518_v25, %v518_v25  ;;  %534 = vst [vmem:[%s231_s12 + $0x8] sm:$0xff] %v518_v25  ;;  %v521_v27 = vadd.f32 %v518_v25, %v516_v24 }
 0x1f7   : > { %522 = vadd.xlane.f32.xlu0 %v521_v27  ;;  %v528_v29 = vadd.f32 %v527_v26, %v526_v28 }
 0x1f9   : > { %529 = vadd.xlane.f32.xlu1 %v528_v29 }
 0x280   : > { %v523_v30 = vpop.xlane.xlu0 %522 }
 0x281   : > { %525 = vst.msk [vmem:[%s235_s15] sm:$0xff] %vm524_vm14, %v523_v30 }
 0x282   : > { %v530_v31 = vpop.xlane.xlu1 %529 }
 0x283   : > { %532 = vst.msk [vmem:[%s235_s15] sm:$0xff] %vm531_vm15, %v530_v31 }
 0x284 PF: > { %s16_s18 = sadd.s32 1, %s661_s18  }
 0x285   : > { %p13_p4 = scmp.ge.s32.totalorder %s16_s18, 4  }
 0x287   :  { %15 = sbr.rel (!%p13_p4) target bundleno = 1 (0x1), region = 78 }

</bundles_post_ra>
